<compile_context>
chip_gen: v5e
topology: v5e:2x2
jax: 0.10.0
libtpu: 0.0.40
codegen_flags: <defaults>
</compile_context>

<pallas_src>
import jax
import jax.numpy as jnp
from jax.experimental import pallas as pl
from jax.experimental.pallas import tpu as pltpu

# ---------------------------------------------------------------------------
# Synthetic config (small shapes consistent with the module's forward pass)
# ---------------------------------------------------------------------------
VOCAB = 256
HIDDEN = 128
N_HEADS = 4
HEAD_DIM = HIDDEN // N_HEADS          # 32
INTER = 256
N_LAYERS = 2
PAD_TOKEN_ID = 0                      # config.pad_token_id: image-token placeholder id

IMG_CH = 3
IMG_SIZE = 16
PATCH = 8
N_PATCHES = (IMG_SIZE // PATCH) ** 2  # 4 image tokens per image
PATCH_DIM = IMG_CH * PATCH * PATCH    # 192
VIS_HIDDEN = 128
VIS_HEADS = 4
VIS_HEAD_DIM = VIS_HIDDEN // VIS_HEADS
VIS_INTER = 256

SEQ_LEN = 16
NUM_IMAGES = 1
RMS_EPS = 1e-5
LN_EPS = 1e-5

NEG_INF = -1e30  # applied in f32 only (scores are f32 accumulations)


# ---------------------------------------------------------------------------
# In-kernel helpers (traced inside Pallas kernels; all math in f32)
# ---------------------------------------------------------------------------
def _rms(x, w):
    var = jnp.mean(x * x, axis=-1, keepdims=True)
    return x * jax.lax.rsqrt(var + RMS_EPS) * w


def _ln(x, w, b):
    mu = jnp.mean(x, axis=-1, keepdims=True)
    var = jnp.mean((x - mu) * (x - mu), axis=-1, keepdims=True)
    return (x - mu) * jax.lax.rsqrt(var + LN_EPS) * w + b


def _mha_into(attn_ref, q, k, v, n_heads, head_dim, mask):
    """All-heads causal attention; each head's (S, head_dim) output is stored into the
    lane slice [h*head_dim:(h+1)*head_dim] of the VMEM scratch `attn_ref` (no lane
    concatenation). q is assumed pre-scaled. Softmax in f32, matmuls bf16 w/ f32 acc."""
    for h in range(n_heads):
        sl = slice(h * head_dim, (h + 1) * head_dim)
        qh = q[:, sl].astype(jnp.bfloat16)
        kh = k[:, sl].astype(jnp.bfloat16)
        vh = v[:, sl].astype(jnp.bfloat16)
        s = jax.lax.dot_general(
            qh, kh, dimension_numbers=(((1,), (1,)), ((), ())),
            preferred_element_type=jnp.float32)
        if mask is not None:
            s = jnp.where(mask, s, NEG_INF)
        mmax = jnp.max(s, axis=-1, keepdims=True)
        p = jnp.exp(s - mmax)
        l = jnp.sum(p, axis=-1, keepdims=True)
        p = p * pl.reciprocal(l, approx=True)        # divide -> EUP slot
        attn_ref[:, sl] = jnp.dot(p.astype(jnp.bfloat16), vh,
                                  preferred_element_type=jnp.float32)


# ---------------------------------------------------------------------------
# Fused language model: ALL decoder layers behind one gridded pallas_call
# ---------------------------------------------------------------------------
def _fused_lm_kernel(
    x_ref, vm_ref, rope_ref, rot_ref,
    in_norm_ref, qkv_w_ref, qkv_b_ref, o_w_ref, o_b_ref,
    post_norm_ref, gu_w_ref, down_w_ref,
    o_ref, attn_scr,
):
    S = x_ref.shape[0]

    @pl.when(pl.program_id(0) == 0)
    def _():
        o_ref[...] = x_ref[...]                       # carried activation lives in o_ref

    x = o_ref[...]                                    # (S, H) f32

    # Vision-expert select mask: lane-dense, hoisted once per layer, sliced per width.
    m_qkv = vm_ref[...]                               # (S, 3H)   for the 384-wide QKV select
    m_int = m_qkv[:, :INTER]                          # (S, 256)  for the MLP-hidden select
    m_hid = m_qkv[:, :HIDDEN]                         # (S, 128)  for the 128-wide selects

    cos_q = rope_ref[0]                               # (S, H), score scale folded in
    sin_q = rope_ref[1]
    cos_k = rope_ref[2]
    sin_k = rope_ref[3]
    rot = rot_ref[...]                                # (H, H) bf16 block-diag rotate-half

    # Causal mask generated in-kernel (no (S,S) operand DMA).
    row = jax.lax.broadcasted_iota(jnp.int32, (S, S), 0)
    col = jax.lax.broadcasted_iota(jnp.int32, (S, S), 1)
    causal = col <= row

    # ---------------- attention block (merged dual-expert QKV / output proj) -------
    xn = _rms(x, in_norm_ref[...])
    xb = xn.astype(jnp.bfloat16)
    qkv = jnp.dot(xb, qkv_w_ref[...], preferred_element_type=jnp.float32) + qkv_b_ref[...]
    qkv_l = qkv[:, :3 * HIDDEN]
    qkv_v = qkv[:, 3 * HIDDEN:]
    qkv = qkv_l + m_qkv * (qkv_v - qkv_l)             # per-token expert select (FMA form)

    q = qkv[:, :HIDDEN]
    k = qkv[:, HIDDEN:2 * HIDDEN]
    v = qkv[:, 2 * HIDDEN:]

    # RoPE on the full (S,128) q/k: rotate-half realised as one matmul with a constant
    # +-1 block-diagonal permutation matrix; q-side cos/sin carry 1/sqrt(head_dim).
    q_rot = jnp.dot(q.astype(jnp.bfloat16), rot, preferred_element_type=jnp.float32)
    k_rot = jnp.dot(k.astype(jnp.bfloat16), rot, preferred_element_type=jnp.float32)
    q = q * cos_q + q_rot * sin_q
    k = k * cos_k + k_rot * sin_k

    _mha_into(attn_scr, q, k, v, N_HEADS, HEAD_DIM, causal)
    attn = attn_scr[...].astype(jnp.bfloat16)

    o_both = jnp.dot(attn, o_w_ref[...], preferred_element_type=jnp.float32) + o_b_ref[...]
    o_l = o_both[:, :HIDDEN]
    o_v = o_both[:, HIDDEN:]
    x = x + o_l + m_hid * (o_v - o_l)

    # ---------------- MLP block (merged dual-expert SwiGLU) -------------------------
    xn = _rms(x, post_norm_ref[...])
    xb = xn.astype(jnp.bfloat16)
    gu = jnp.dot(xb, gu_w_ref[...], preferred_element_type=jnp.float32)   # (S, 4*INTER)
    g_l = gu[:, 0 * INTER:1 * INTER]
    u_l = gu[:, 1 * INTER:2 * INTER]
    g_v = gu[:, 2 * INTER:3 * INTER]
    u_v = gu[:, 3 * INTER:4 * INTER]
    h_l = jax.nn.silu(g_l) * u_l                       # elementwise in f32 (v5e-safe)
    h_v = jax.nn.silu(g_v) * u_v
    h = h_l + m_int * (h_v - h_l)

    d = jnp.dot(h.astype(jnp.bfloat16), down_w_ref[...],
                preferred_element_type=jnp.float32)    # (S, 2H)
    d_l = d[:, :HIDDEN]
    d_v = d[:, HIDDEN:]
    o_ref[...] = x + d_l + m_hid * (d_v - d_l)


def fused_language_model(x, vm_full, rope, rot_mat, lm):
    S, H = x.shape
    same2 = lambda l: (0, 0)
    same3 = lambda l: (0, 0, 0)
    per_layer = lambda l: (l, 0, 0)
    in_specs = [
        pl.BlockSpec((S, H), same2),                       # x
        pl.BlockSpec((S, 3 * H), same2),                   # vision-expert mask
        pl.BlockSpec((4, S, H), same3),                    # [cos_q, sin_q, cos_k, sin_k]
        pl.BlockSpec((H, H), same2),                       # RoPE rotate-half matrix
        pl.BlockSpec((None, 1, H), per_layer),             # input_norm
        pl.BlockSpec((None, H, 2 * 3 * H), per_layer),     # qkv_w  (lang || vision)
        pl.BlockSpec((None, 1, 2 * 3 * H), per_layer),     # qkv_b
        pl.BlockSpec((None, H, 2 * H), per_layer),         # o_w
        pl.BlockSpec((None, 1, 2 * H), per_layer),         # o_b
        pl.BlockSpec((None, 1, H), per_layer),             # post_norm
        pl.BlockSpec((None, H, 4 * INTER), per_layer),     # gate_l | up_l | gate_v | up_v
        pl.BlockSpec((None, INTER, 2 * H), per_layer),     # down_l || down_v
    ]
    return pl.pallas_call(
        _fused_lm_kernel,
        out_shape=jax.ShapeDtypeStruct((S, H), jnp.float32),
        grid_spec=pltpu.PrefetchScalarGridSpec(
            num_scalar_prefetch=0,
            grid=(N_LAYERS,),
            in_specs=in_specs,
            out_specs=pl.BlockSpec((S, H), same2),          # same block every layer ->
            scratch_shapes=[pltpu.VMEM((S, H), jnp.float32)],  # VMEM-resident carry
        ),
        compiler_params=pltpu.CompilerParams(
            dimension_semantics=("arbitrary",)),
    )(x, vm_full, rope, rot_mat,
      lm["input_norm"], lm["qkv_w"], lm["qkv_b"], lm["o_w"], lm["o_b"],
      lm["post_norm"], lm["gu_w"], lm["down_w"])


# ---------------------------------------------------------------------------
# Fused vision-tower kernel (one pallas_call for the whole tower)
# ---------------------------------------------------------------------------
def _vision_tower_kernel(
    patches_ref, pos_ref,
    patch_w_ref, patch_b_ref,
    ln1_w_ref, ln1_b_ref, qkv_w_ref, qkv_b_ref, proj_w_ref, proj_b_ref,
    ln2_w_ref, ln2_b_ref, fc1_w_ref, fc1_b_ref, fc2_w_ref, fc2_b_ref,
    post_w_ref, post_b_ref, adapter_w_ref, adapter_b_ref,
    o_ref, attn_scr,
):
    pb = patches_ref[...].astype(jnp.bfloat16)
    x = (jnp.dot(pb, patch_w_ref[...], preferred_element_type=jnp.float32)
         + patch_b_ref[...] + pos_ref[...])              # (P, Vh) f32

    # pre-LN transformer block
    xn = _ln(x, ln1_w_ref[...], ln1_b_ref[...])
    xb = xn.astype(jnp.bfloat16)
    qkv = jnp.dot(xb, qkv_w_ref[...], preferred_element_type=jnp.float32) + qkv_b_ref[...]
    q = qkv[:, :VIS_HIDDEN] * (VIS_HEAD_DIM ** -0.5)
    k = qkv[:, VIS_HIDDEN:2 * VIS_HIDDEN]
    v = qkv[:, 2 * VIS_HIDDEN:]
    _mha_into(attn_scr, q, k, v, VIS_HEADS, VIS_HEAD_DIM, None)
    x = x + (jnp.dot(attn_scr[...].astype(jnp.bfloat16), proj_w_ref[...],
                     preferred_element_type=jnp.float32) + proj_b_ref[...])

    xn = _ln(x, ln2_w_ref[...], ln2_b_ref[...])
    h = jnp.dot(xn.astype(jnp.bfloat16), fc1_w_ref[...],
                preferred_element_type=jnp.float32) + fc1_b_ref[...]
    h = jax.nn.gelu(h)                                   # elementwise in f32
    x = x + (jnp.dot(h.astype(jnp.bfloat16), fc2_w_ref[...],
                     preferred_element_type=jnp.float32) + fc2_b_ref[...])

    x = _ln(x, post_w_ref[...], post_b_ref[...])
    # TODO(synk): real CogVLM2 uses a conv-downsample + GLU adapter; linear adapter here.
    o_ref[...] = (jnp.dot(x.astype(jnp.bfloat16), adapter_w_ref[...],
                          preferred_element_type=jnp.float32) + adapter_b_ref[...])


def vision_tower_call(patches, pos_emb, v):
    return pl.pallas_call(
        _vision_tower_kernel,
        out_shape=jax.ShapeDtypeStruct((patches.shape[0], HIDDEN), jnp.float32),
        scratch_shapes=[pltpu.VMEM((patches.shape[0], VIS_HIDDEN), jnp.float32)],
    )(patches, pos_emb,
      v["patch_w"], v["patch_b"],
      v["ln1_w"], v["ln1_b"], v["qkv_w"], v["qkv_b"], v["proj_w"], v["proj_b"],
      v["ln2_w"], v["ln2_b"], v["fc1_w"], v["fc1_b"], v["fc2_w"], v["fc2_b"],
      v["post_ln_w"], v["post_ln_b"], v["adapter_w"], v["adapter_b"])


# ---------------------------------------------------------------------------
# Final RMSNorm + lm_head (single un-gridded call, lane-dense 256-wide output)
# ---------------------------------------------------------------------------
def _norm_lm_head_kernel(x_ref, nw_ref, w_ref, o_ref):
    xn = _rms(x_ref[...], nw_ref[...])
    o_ref[...] = jnp.dot(xn.astype(jnp.bfloat16), w_ref[...],
                         preferred_element_type=jnp.float32)


def norm_lm_head(x, norm_w, w):
    return pl.pallas_call(
        _norm_lm_head_kernel,
        out_shape=jax.ShapeDtypeStruct((x.shape[0], w.shape[1]), jnp.float32),
    )(x, norm_w, w)


# ---------------------------------------------------------------------------
# Rotary embedding tables (host-side glue, computed once)
# ---------------------------------------------------------------------------
def rope_cos_sin(position_ids, dim, base=10000.0):
    inv_freq = 1.0 / (base ** (jnp.arange(0, dim, 2, dtype=jnp.float32) / dim))
    freqs = position_ids.astype(jnp.float32)[:, None] * inv_freq[None, :]
    emb = jnp.concatenate([freqs, freqs], axis=-1)   # (S, dim)
    return jnp.cos(emb), jnp.sin(emb)


def rope_rotation_matrix(n_heads, head_dim):
    """Block-diagonal +-1 matrix R with rot = x @ R == rotate_half(x) per head."""
    d = n_heads * head_dim
    half = head_dim // 2
    col = jnp.arange(d)
    pos = col % head_dim
    src = jnp.where(pos < half, col + half, col - half)   # source row feeding column `col`
    sign = jnp.where(pos < half, -1.0, 1.0)
    r = jnp.zeros((d, d), jnp.float32).at[src, col].set(sign)
    return r.astype(jnp.bfloat16)


# ---------------------------------------------------------------------------
# Deterministic parameter initialisation (matmul weights stored bf16, merged/stacked)
# ---------------------------------------------------------------------------
def _w(key, shape, scale=0.02):
    return (scale * jax.random.normal(key, shape, dtype=jnp.float32)).astype(jnp.bfloat16)


def init_params(key):
    keys = iter(jax.random.split(key, 256))
    p = {}

    # language model (embedding kept f32 for the gather path)
    p["embed_tokens"] = 0.02 * jax.random.normal(next(keys), (VOCAB, HIDDEN), dtype=jnp.float32)

    in_norm, qkv_w, qkv_b, o_w, o_b, post_norm, gu_w, down_w = ([] for _ in range(8))
    for _ in range(N_LAYERS):
        in_norm.append(jnp.ones((1, HIDDEN), jnp.float32))
        # dual experts merged along the output dim -> one wide MXU matmul each
        qkv_w.append(jnp.concatenate(
            [_w(next(keys), (HIDDEN, 3 * HIDDEN)), _w(next(keys), (HIDDEN, 3 * HIDDEN))], axis=1))
        qkv_b.append(jnp.zeros((1, 2 * 3 * HIDDEN), jnp.float32))
        o_w.append(jnp.concatenate(
            [_w(next(keys), (HIDDEN, HIDDEN)), _w(next(keys), (HIDDEN, HIDDEN))], axis=1))
        o_b.append(jnp.zeros((1, 2 * HIDDEN), jnp.float32))
        post_norm.append(jnp.ones((1, HIDDEN), jnp.float32))
        gu_w.append(jnp.concatenate(
            [_w(next(keys), (HIDDEN, INTER)), _w(next(keys), (HIDDEN, INTER)),
             _w(next(keys), (HIDDEN, INTER)), _w(next(keys), (HIDDEN, INTER))], axis=1))
        down_w.append(jnp.concatenate(
            [_w(next(keys), (INTER, HIDDEN)), _w(next(keys), (INTER, HIDDEN))], axis=1))

    p["lm"] = {                                        # stacked along a leading layer dim
        "input_norm": jnp.stack(in_norm), "qkv_w": jnp.stack(qkv_w), "qkv_b": jnp.stack(qkv_b),
        "o_w": jnp.stack(o_w), "o_b": jnp.stack(o_b), "post_norm": jnp.stack(post_norm),
        "gu_w": jnp.stack(gu_w), "down_w": jnp.stack(down_w),
    }
    p["final_norm"] = jnp.ones((1, HIDDEN), jnp.float32)
    p["lm_head_w"] = _w(next(keys), (HIDDEN, VOCAB))

    # vision tower
    p["vision"] = {
        "patch_w": _w(next(keys), (PATCH_DIM, VIS_HIDDEN)),
        "patch_b": jnp.zeros((1, VIS_HIDDEN), jnp.float32),
        "pos_emb": 0.02 * jax.random.normal(next(keys), (N_PATCHES, VIS_HIDDEN), dtype=jnp.float32),
        "ln1_w": jnp.ones((1, VIS_HIDDEN), jnp.float32),
        "ln1_b": jnp.zeros((1, VIS_HIDDEN), jnp.float32),
        "qkv_w": _w(next(keys), (VIS_HIDDEN, 3 * VIS_HIDDEN)),
        "qkv_b": jnp.zeros((1, 3 * VIS_HIDDEN), jnp.float32),
        "proj_w": _w(next(keys), (VIS_HIDDEN, VIS_HIDDEN)),
        "proj_b": jnp.zeros((1, VIS_HIDDEN), jnp.float32),
        "ln2_w": jnp.ones((1, VIS_HIDDEN), jnp.float32),
        "ln2_b": jnp.zeros((1, VIS_HIDDEN), jnp.float32),
        "fc1_w": _w(next(keys), (VIS_HIDDEN, VIS_INTER)),
        "fc1_b": jnp.zeros((1, VIS_INTER), jnp.float32),
        "fc2_w": _w(next(keys), (VIS_INTER, VIS_HIDDEN)),
        "fc2_b": jnp.zeros((1, VIS_HIDDEN), jnp.float32),
        "post_ln_w": jnp.ones((1, VIS_HIDDEN), jnp.float32),
        "post_ln_b": jnp.zeros((1, VIS_HIDDEN), jnp.float32),
        "adapter_w": _w(next(keys), (VIS_HIDDEN, HIDDEN)),
        "adapter_b": jnp.zeros((1, HIDDEN), jnp.float32),
    }
    return p


# ---------------------------------------------------------------------------
# Model
# ---------------------------------------------------------------------------
class Cogvlm2ForConditionalGeneration:
    def __init__(self, params):
        self.p = params
        self.pad_token_id = PAD_TOKEN_ID
        self.vocab_size = VOCAB
        self.rot_mat = rope_rotation_matrix(N_HEADS, HEAD_DIM)   # (H, H) bf16, built once

    # ----------------------------- vision tower ---------------------------
    def vision_tower(self, pixel_values):
        n, c, h, w = pixel_values.shape
        gh, gw = h // PATCH, w // PATCH
        # layout: NCHW -> (N * num_patches, C * P * P) row-major patch vectors
        patches = pixel_values.reshape(n, c, gh, PATCH, gw, PATCH)
        patches = patches.transpose(0, 2, 4, 1, 3, 5).reshape(n * gh * gw, c * PATCH * PATCH)
        patches = patches.astype(jnp.float32)

        v = self.p["vision"]
        pos = jnp.tile(v["pos_emb"], (n, 1))
        feats = vision_tower_call(patches, pos, v)          # (N*P, HIDDEN)
        return feats.reshape(n, gh * gw, HIDDEN)

    # ------------------------ merge image features ------------------------
    def _merge_input_ids_with_image_features(self, input_ids, inputs_embeds, image_features):
        mask = input_ids == self.pad_token_id
        flat = image_features.reshape(-1, image_features.shape[-1])
        # inputs_embeds[mask] = flat  (pad positions filled in order with image features)
        idx = jnp.clip(jnp.cumsum(mask.astype(jnp.int32)) - 1, 0, flat.shape[0] - 1)
        inputs_embeds = jnp.where(mask[:, None], flat[idx], inputs_embeds)
        return inputs_embeds, mask

    # --------------------------- language model ---------------------------
    def language_model_model(self, inputs_embeds, position_ids, vision_mask):
        S = inputs_embeds.shape[0]
        if vision_mask is None:
            vm = jnp.zeros((S,), jnp.float32)
        else:
            vm = vision_mask.astype(jnp.float32)
        # lane-dense mask operand wide enough for the 384-wide QKV select; narrower
        # selects slice it in-kernel (no per-select re-broadcast from lane 0).
        vm_full = jnp.broadcast_to(vm[:, None], (S, 3 * HIDDEN))

        cos, sin = rope_cos_sin(position_ids, HEAD_DIM)          # (S, HEAD_DIM)
        cos = jnp.tile(cos, (1, N_HEADS))                        # (S, HIDDEN), per-head tiled
        sin = jnp.tile(sin, (1, N_HEADS))
        scale = HEAD_DIM ** -0.5                                 # fold score scale into q side
        rope = jnp.stack([cos * scale, sin * scale, cos, sin], axis=0)   # (4, S, HIDDEN)

        x = inputs_embeds.astype(jnp.float32)
        # NOTE: final RMSNorm is fused into the lm_head kernel (row-wise norm commutes
        # with the lm_head_indices gather).
        return fused_language_model(x, vm_full, rope, self.rot_mat, self.p["lm"])

    # ------------------------------- forward -------------------------------
    def forward(self, input_ids, position_ids, cu_seqlen_prefill, kv_cache, block_tables,
                slots, input_lengths, max_s, prefill_cache_indices, lm_head_indices=None,
                pixel_values=None, pixel_attention_mask=None, image_sizes=None):
        inputs_embeds = jnp.take(self.p["embed_tokens"], input_ids, axis=0)

        if pixel_values is not None and pixel_values.shape[0] > 0:
            num_images = pixel_values.shape[0]
            image_features = self.vision_tower(pixel_values)
            inputs_embeds, vision_mask = self._merge_input_ids_with_image_features(
                input_ids, inputs_embeds, image_features)
            for i in range(num_images):
                cu_seqlen_start = cu_seqlen_prefill[i]
                # Real model clears the mask at offset 1 + 1 + 2304 (EOI boundary token);
                # adapted to this model's number of image tokens.
                boundary = jnp.clip(cu_seqlen_start + 1 + 1 + N_PATCHES,
                                    0, vision_mask.shape[0] - 1)
                vision_mask = vision_mask.at[boundary].set(False)
        else:
            vision_mask = None

        hidden_states = self.language_model_model(inputs_embeds, position_ids, vision_mask)

        if lm_head_indices is not None:
            hidden_states = hidden_states[lm_head_indices]
        logits = norm_lm_head(hidden_states, self.p["final_norm"], self.p["lm_head_w"])
        speculative_logits = None
        return logits, speculative_logits


# ---------------------------------------------------------------------------
# main
# ---------------------------------------------------------------------------
if __name__ == "__main__":
    key = jax.random.PRNGKey(0)
    k_params, k_ids, k_pix = jax.random.split(key, 3)

    params = init_params(k_params)
    model = Cogvlm2ForConditionalGeneration(params)

    # single prefill sequence of length 16; positions 1..4 are image-token placeholders
    input_ids = jax.random.randint(k_ids, (SEQ_LEN,), 1, VOCAB, dtype=jnp.int32)
    input_ids = input_ids.at[1:1 + NUM_IMAGES * N_PATCHES].set(PAD_TOKEN_ID)
    position_ids = jnp.arange(SEQ_LEN, dtype=jnp.int32)
    cu_seqlen_prefill = jnp.array([0, SEQ_LEN], dtype=jnp.int32)
    input_lengths = jnp.array([SEQ_LEN], dtype=jnp.int32)
    lm_head_indices = jnp.array([SEQ_LEN - 1], dtype=jnp.int32)
    pixel_values = jax.random.normal(k_pix, (NUM_IMAGES, IMG_CH, IMG_SIZE, IMG_SIZE),
                                     dtype=jnp.float32)

    logits, speculative_logits = model.forward(
        input_ids=input_ids,
        position_ids=position_ids,
        cu_seqlen_prefill=cu_seqlen_prefill,
        kv_cache=[],                 # TODO(synk): paged KV cache unused in this synthetic prefill
        block_tables=None,
        slots=None,
        input_lengths=input_lengths,
        max_s=SEQ_LEN,
        prefill_cache_indices=None,
        lm_head_indices=lm_head_indices,
        pixel_values=pixel_values,
    )
    jax.block_until_ready(logits)
    assert logits.shape == (1, VOCAB) and speculative_logits is None
    print("KERNEL_OK")
</pallas_src>

<mosaic_0001>
module attributes {stable_mosaic.version = 11 : i64} {
  func.func @_vision_tower_kernel(%arg0: memref<4x192xf32, #tpu.memory_space<vmem>>, %arg1: memref<4x128xf32, #tpu.memory_space<vmem>>, %arg2: memref<192x128xbf16, #tpu.memory_space<vmem>>, %arg3: memref<1x128xf32, #tpu.memory_space<vmem>>, %arg4: memref<1x128xf32, #tpu.memory_space<vmem>>, %arg5: memref<1x128xf32, #tpu.memory_space<vmem>>, %arg6: memref<128x384xbf16, #tpu.memory_space<vmem>>, %arg7: memref<1x384xf32, #tpu.memory_space<vmem>>, %arg8: memref<128x128xbf16, #tpu.memory_space<vmem>>, %arg9: memref<1x128xf32, #tpu.memory_space<vmem>>, %arg10: memref<1x128xf32, #tpu.memory_space<vmem>>, %arg11: memref<1x128xf32, #tpu.memory_space<vmem>>, %arg12: memref<128x256xbf16, #tpu.memory_space<vmem>>, %arg13: memref<1x256xf32, #tpu.memory_space<vmem>>, %arg14: memref<256x128xbf16, #tpu.memory_space<vmem>>, %arg15: memref<1x128xf32, #tpu.memory_space<vmem>>, %arg16: memref<1x128xf32, #tpu.memory_space<vmem>>, %arg17: memref<1x128xf32, #tpu.memory_space<vmem>>, %arg18: memref<128x128xbf16, #tpu.memory_space<vmem>>, %arg19: memref<1x128xf32, #tpu.memory_space<vmem>>, %arg20: memref<4x128xf32, #tpu.memory_space<vmem>>, %arg21: memref<4x128xf32, #tpu.memory_space<vmem>>) attributes {dimension_semantics = [], scalar_prefetch = 0 : i64, scratch_operands = 1 : i64, tpu.core_type = #tpu.core_type<tc>} {
    %c0 = arith.constant 0 : index
    %c0_0 = arith.constant 0 : index
    %0 = vector.load %arg0[%c0, %c0_0] : memref<4x192xf32, #tpu.memory_space<vmem>>, vector<4x192xf32>
    %1 = arith.truncf %0 : vector<4x192xf32> to vector<4x192xbf16>
    %c0_1 = arith.constant 0 : index
    %c0_2 = arith.constant 0 : index
    %2 = vector.load %arg2[%c0_1, %c0_2] : memref<192x128xbf16, #tpu.memory_space<vmem>>, vector<192x128xbf16>
    %cst = arith.constant dense<0.000000e+00> : vector<4x128xf32>
    %3 = tpu.matmul %1, %2, %cst {dimension_numbers = #tpu.dot_dimension_numbers<[1], [0], [0], [1], [0, 0, 1, 1], [], []>} : vector<4x192xbf16>, vector<192x128xbf16>, vector<4x128xf32> -> vector<4x128xf32>
    %c0_3 = arith.constant 0 : index
    %c0_4 = arith.constant 0 : index
    %4 = vector.load %arg3[%c0_3, %c0_4] : memref<1x128xf32, #tpu.memory_space<vmem>>, vector<1x128xf32>
    %5 = vector.broadcast %4 : vector<1x128xf32> to vector<4x128xf32>
    %6 = arith.addf %3, %5 : vector<4x128xf32>
    %c0_5 = arith.constant 0 : index
    %c0_6 = arith.constant 0 : index
    %7 = vector.load %arg1[%c0_5, %c0_6] : memref<4x128xf32, #tpu.memory_space<vmem>>, vector<4x128xf32>
    %8 = arith.addf %6, %7 : vector<4x128xf32>
    %c0_7 = arith.constant 0 : index
    %c0_8 = arith.constant 0 : index
    %9 = vector.load %arg4[%c0_7, %c0_8] : memref<1x128xf32, #tpu.memory_space<vmem>>, vector<1x128xf32>
    %c0_9 = arith.constant 0 : index
    %c0_10 = arith.constant 0 : index
    %10 = vector.load %arg5[%c0_9, %c0_10] : memref<1x128xf32, #tpu.memory_space<vmem>>, vector<1x128xf32>
    %cst_11 = arith.constant dense<0.000000e+00> : vector<4xf32>
    %11 = vector.multi_reduction <add>, %8, %cst_11 [1] : vector<4x128xf32> to vector<4xf32>
    %12 = vector.shape_cast %11 : vector<4xf32> to vector<4x1xf32>
    %cst_12 = arith.constant 1.280000e+02 : f32
    %13 = vector.broadcast %cst_12 : f32 to vector<4x1xf32>
    %14 = arith.divf %12, %13 : vector<4x1xf32>
    %15 = vector.broadcast %14 : vector<4x1xf32> to vector<4x128xf32>
    %16 = arith.subf %8, %15 : vector<4x128xf32>
    %17 = vector.broadcast %14 : vector<4x1xf32> to vector<4x128xf32>
    %18 = arith.subf %8, %17 : vector<4x128xf32>
    %19 = arith.mulf %16, %18 : vector<4x128xf32>
    %cst_13 = arith.constant dense<0.000000e+00> : vector<4xf32>
    %20 = vector.multi_reduction <add>, %19, %cst_13 [1] : vector<4x128xf32> to vector<4xf32>
    %21 = vector.shape_cast %20 : vector<4xf32> to vector<4x1xf32>
    %cst_14 = arith.constant 1.280000e+02 : f32
    %22 = vector.broadcast %cst_14 : f32 to vector<4x1xf32>
    %23 = arith.divf %21, %22 : vector<4x1xf32>
    %24 = vector.broadcast %14 : vector<4x1xf32> to vector<4x128xf32>
    %25 = arith.subf %8, %24 : vector<4x128xf32>
    %cst_15 = arith.constant 9.99999974E-6 : f32
    %26 = vector.broadcast %cst_15 : f32 to vector<4x1xf32>
    %27 = arith.addf %23, %26 : vector<4x1xf32>
    %28 = math.rsqrt %27 : vector<4x1xf32>
    %29 = vector.broadcast %28 : vector<4x1xf32> to vector<4x128xf32>
    %30 = arith.mulf %25, %29 : vector<4x128xf32>
    %31 = vector.broadcast %9 : vector<1x128xf32> to vector<4x128xf32>
    %32 = arith.mulf %30, %31 : vector<4x128xf32>
    %33 = vector.broadcast %10 : vector<1x128xf32> to vector<4x128xf32>
    %34 = arith.addf %32, %33 : vector<4x128xf32>
    %35 = arith.truncf %34 : vector<4x128xf32> to vector<4x128xbf16>
    %c0_16 = arith.constant 0 : index
    %c0_17 = arith.constant 0 : index
    %36 = vector.load %arg6[%c0_16, %c0_17] : memref<128x384xbf16, #tpu.memory_space<vmem>>, vector<128x384xbf16>
    %cst_18 = arith.constant dense<0.000000e+00> : vector<4x384xf32>
    %37 = tpu.matmul %35, %36, %cst_18 {dimension_numbers = #tpu.dot_dimension_numbers<[1], [0], [0], [1], [0, 0, 1, 1], [], []>} : vector<4x128xbf16>, vector<128x384xbf16>, vector<4x384xf32> -> vector<4x384xf32>
    %c0_19 = arith.constant 0 : index
    %c0_20 = arith.constant 0 : index
    %38 = vector.load %arg7[%c0_19, %c0_20] : memref<1x384xf32, #tpu.memory_space<vmem>>, vector<1x384xf32>
    %39 = vector.broadcast %38 : vector<1x384xf32> to vector<4x384xf32>
    %40 = arith.addf %37, %39 : vector<4x384xf32>
    %41 = vector.extract_strided_slice %40 {offsets = [0, 0], sizes = [4, 128], strides = [1, 1]} : vector<4x384xf32> to vector<4x128xf32>
    %cst_21 = arith.constant 0.176776692 : f32
    %42 = vector.broadcast %cst_21 : f32 to vector<4x128xf32>
    %43 = arith.mulf %41, %42 : vector<4x128xf32>
    %44 = vector.extract_strided_slice %40 {offsets = [0, 128], sizes = [4, 128], strides = [1, 1]} : vector<4x384xf32> to vector<4x128xf32>
    %45 = vector.extract_strided_slice %40 {offsets = [0, 256], sizes = [4, 128], strides = [1, 1]} : vector<4x384xf32> to vector<4x128xf32>
    %46 = vector.extract_strided_slice %43 {offsets = [0, 0], sizes = [4, 32], strides = [1, 1]} : vector<4x128xf32> to vector<4x32xf32>
    %47 = arith.truncf %46 : vector<4x32xf32> to vector<4x32xbf16>
    %48 = vector.extract_strided_slice %44 {offsets = [0, 0], sizes = [4, 32], strides = [1, 1]} : vector<4x128xf32> to vector<4x32xf32>
    %49 = arith.truncf %48 : vector<4x32xf32> to vector<4x32xbf16>
    %50 = vector.extract_strided_slice %45 {offsets = [0, 0], sizes = [4, 32], strides = [1, 1]} : vector<4x128xf32> to vector<4x32xf32>
    %51 = arith.truncf %50 : vector<4x32xf32> to vector<4x32xbf16>
    %cst_22 = arith.constant dense<0.000000e+00> : vector<4x4xf32>
    %52 = tpu.matmul %47, %49, %cst_22 {dimension_numbers = #tpu.dot_dimension_numbers<[1], [1], [0], [0], [0, 0, 1, 0], [], []>} : vector<4x32xbf16>, vector<4x32xbf16>, vector<4x4xf32> -> vector<4x4xf32>
    %cst_23 = arith.constant dense<0xFF800000> : vector<4xf32>
    %53 = vector.multi_reduction <maximumf>, %52, %cst_23 [1] : vector<4x4xf32> to vector<4xf32>
    %54 = vector.shape_cast %53 : vector<4xf32> to vector<4x1xf32>
    %55 = vector.broadcast %54 : vector<4x1xf32> to vector<4x4xf32>
    %56 = arith.subf %52, %55 : vector<4x4xf32>
    %57 = math.exp %56 : vector<4x4xf32>
    %cst_24 = arith.constant dense<0.000000e+00> : vector<4xf32>
    %58 = vector.multi_reduction <add>, %57, %cst_24 [1] : vector<4x4xf32> to vector<4xf32>
    %59 = vector.shape_cast %58 : vector<4xf32> to vector<4x1xf32>
    %60 = tpu.reciprocal %59 {approx = true} : vector<4x1xf32> -> vector<4x1xf32>
    %61 = vector.broadcast %60 : vector<4x1xf32> to vector<4x4xf32>
    %62 = arith.mulf %57, %61 : vector<4x4xf32>
    %63 = arith.truncf %62 : vector<4x4xf32> to vector<4x4xbf16>
    %cst_25 = arith.constant dense<0.000000e+00> : vector<4x32xf32>
    %64 = tpu.matmul %63, %51, %cst_25 {dimension_numbers = #tpu.dot_dimension_numbers<[1], [0], [0], [1], [0, 0, 1, 1], [], []>} : vector<4x4xbf16>, vector<4x32xbf16>, vector<4x32xf32> -> vector<4x32xf32>
    %c0_26 = arith.constant 0 : index
    %c0_27 = arith.constant 0 : index
    %65 = vector.load %arg21[%c0_26, %c0_27] : memref<4x128xf32, #tpu.memory_space<vmem>>, vector<4x32xf32>
    tpu.vector_store %arg21[%c0_26, %c0_27], %64 {strides = array<i32>} : memref<4x128xf32, #tpu.memory_space<vmem>>, vector<4x32xf32>,
    %66 = vector.extract_strided_slice %43 {offsets = [0, 32], sizes = [4, 32], strides = [1, 1]} : vector<4x128xf32> to vector<4x32xf32>
    %67 = arith.truncf %66 : vector<4x32xf32> to vector<4x32xbf16>
    %68 = vector.extract_strided_slice %44 {offsets = [0, 32], sizes = [4, 32], strides = [1, 1]} : vector<4x128xf32> to vector<4x32xf32>
    %69 = arith.truncf %68 : vector<4x32xf32> to vector<4x32xbf16>
    %70 = vector.extract_strided_slice %45 {offsets = [0, 32], sizes = [4, 32], strides = [1, 1]} : vector<4x128xf32> to vector<4x32xf32>
    %71 = arith.truncf %70 : vector<4x32xf32> to vector<4x32xbf16>
    %cst_28 = arith.constant dense<0.000000e+00> : vector<4x4xf32>
    %72 = tpu.matmul %67, %69, %cst_28 {dimension_numbers = #tpu.dot_dimension_numbers<[1], [1], [0], [0], [0, 0, 1, 0], [], []>} : vector<4x32xbf16>, vector<4x32xbf16>, vector<4x4xf32> -> vector<4x4xf32>
    %cst_29 = arith.constant dense<0xFF800000> : vector<4xf32>
    %73 = vector.multi_reduction <maximumf>, %72, %cst_29 [1] : vector<4x4xf32> to vector<4xf32>
    %74 = vector.shape_cast %73 : vector<4xf32> to vector<4x1xf32>
    %75 = vector.broadcast %74 : vector<4x1xf32> to vector<4x4xf32>
    %76 = arith.subf %72, %75 : vector<4x4xf32>
    %77 = math.exp %76 : vector<4x4xf32>
    %cst_30 = arith.constant dense<0.000000e+00> : vector<4xf32>
    %78 = vector.multi_reduction <add>, %77, %cst_30 [1] : vector<4x4xf32> to vector<4xf32>
    %79 = vector.shape_cast %78 : vector<4xf32> to vector<4x1xf32>
    %80 = tpu.reciprocal %79 {approx = true} : vector<4x1xf32> -> vector<4x1xf32>
    %81 = vector.broadcast %80 : vector<4x1xf32> to vector<4x4xf32>
    %82 = arith.mulf %77, %81 : vector<4x4xf32>
    %83 = arith.truncf %82 : vector<4x4xf32> to vector<4x4xbf16>
    %cst_31 = arith.constant dense<0.000000e+00> : vector<4x32xf32>
    %84 = tpu.matmul %83, %71, %cst_31 {dimension_numbers = #tpu.dot_dimension_numbers<[1], [0], [0], [1], [0, 0, 1, 1], [], []>} : vector<4x4xbf16>, vector<4x32xbf16>, vector<4x32xf32> -> vector<4x32xf32>
    %c0_32 = arith.constant 0 : index
    %c32 = arith.constant 32 : index
    %85 = vector.load %arg21[%c0_32, %c32] : memref<4x128xf32, #tpu.memory_space<vmem>>, vector<4x32xf32>
    tpu.vector_store %arg21[%c0_32, %c32], %84 {strides = array<i32>} : memref<4x128xf32, #tpu.memory_space<vmem>>, vector<4x32xf32>,
    %86 = vector.extract_strided_slice %43 {offsets = [0, 64], sizes = [4, 32], strides = [1, 1]} : vector<4x128xf32> to vector<4x32xf32>
    %87 = arith.truncf %86 : vector<4x32xf32> to vector<4x32xbf16>
    %88 = vector.extract_strided_slice %44 {offsets = [0, 64], sizes = [4, 32], strides = [1, 1]} : vector<4x128xf32> to vector<4x32xf32>
    %89 = arith.truncf %88 : vector<4x32xf32> to vector<4x32xbf16>
    %90 = vector.extract_strided_slice %45 {offsets = [0, 64], sizes = [4, 32], strides = [1, 1]} : vector<4x128xf32> to vector<4x32xf32>
    %91 = arith.truncf %90 : vector<4x32xf32> to vector<4x32xbf16>
    %cst_33 = arith.constant dense<0.000000e+00> : vector<4x4xf32>
    %92 = tpu.matmul %87, %89, %cst_33 {dimension_numbers = #tpu.dot_dimension_numbers<[1], [1], [0], [0], [0, 0, 1, 0], [], []>} : vector<4x32xbf16>, vector<4x32xbf16>, vector<4x4xf32> -> vector<4x4xf32>
    %cst_34 = arith.constant dense<0xFF800000> : vector<4xf32>
    %93 = vector.multi_reduction <maximumf>, %92, %cst_34 [1] : vector<4x4xf32> to vector<4xf32>
    %94 = vector.shape_cast %93 : vector<4xf32> to vector<4x1xf32>
    %95 = vector.broadcast %94 : vector<4x1xf32> to vector<4x4xf32>
    %96 = arith.subf %92, %95 : vector<4x4xf32>
    %97 = math.exp %96 : vector<4x4xf32>
    %cst_35 = arith.constant dense<0.000000e+00> : vector<4xf32>
    %98 = vector.multi_reduction <add>, %97, %cst_35 [1] : vector<4x4xf32> to vector<4xf32>
    %99 = vector.shape_cast %98 : vector<4xf32> to vector<4x1xf32>
    %100 = tpu.reciprocal %99 {approx = true} : vector<4x1xf32> -> vector<4x1xf32>
    %101 = vector.broadcast %100 : vector<4x1xf32> to vector<4x4xf32>
    %102 = arith.mulf %97, %101 : vector<4x4xf32>
    %103 = arith.truncf %102 : vector<4x4xf32> to vector<4x4xbf16>
    %cst_36 = arith.constant dense<0.000000e+00> : vector<4x32xf32>
    %104 = tpu.matmul %103, %91, %cst_36 {dimension_numbers = #tpu.dot_dimension_numbers<[1], [0], [0], [1], [0, 0, 1, 1], [], []>} : vector<4x4xbf16>, vector<4x32xbf16>, vector<4x32xf32> -> vector<4x32xf32>
    %c0_37 = arith.constant 0 : index
    %c64 = arith.constant 64 : index
    %105 = vector.load %arg21[%c0_37, %c64] : memref<4x128xf32, #tpu.memory_space<vmem>>, vector<4x32xf32>
    tpu.vector_store %arg21[%c0_37, %c64], %104 {strides = array<i32>} : memref<4x128xf32, #tpu.memory_space<vmem>>, vector<4x32xf32>,
    %106 = vector.extract_strided_slice %43 {offsets = [0, 96], sizes = [4, 32], strides = [1, 1]} : vector<4x128xf32> to vector<4x32xf32>
    %107 = arith.truncf %106 : vector<4x32xf32> to vector<4x32xbf16>
    %108 = vector.extract_strided_slice %44 {offsets = [0, 96], sizes = [4, 32], strides = [1, 1]} : vector<4x128xf32> to vector<4x32xf32>
    %109 = arith.truncf %108 : vector<4x32xf32> to vector<4x32xbf16>
    %110 = vector.extract_strided_slice %45 {offsets = [0, 96], sizes = [4, 32], strides = [1, 1]} : vector<4x128xf32> to vector<4x32xf32>
    %111 = arith.truncf %110 : vector<4x32xf32> to vector<4x32xbf16>
    %cst_38 = arith.constant dense<0.000000e+00> : vector<4x4xf32>
    %112 = tpu.matmul %107, %109, %cst_38 {dimension_numbers = #tpu.dot_dimension_numbers<[1], [1], [0], [0], [0, 0, 1, 0], [], []>} : vector<4x32xbf16>, vector<4x32xbf16>, vector<4x4xf32> -> vector<4x4xf32>
    %cst_39 = arith.constant dense<0xFF800000> : vector<4xf32>
    %113 = vector.multi_reduction <maximumf>, %112, %cst_39 [1] : vector<4x4xf32> to vector<4xf32>
    %114 = vector.shape_cast %113 : vector<4xf32> to vector<4x1xf32>
    %115 = vector.broadcast %114 : vector<4x1xf32> to vector<4x4xf32>
    %116 = arith.subf %112, %115 : vector<4x4xf32>
    %117 = math.exp %116 : vector<4x4xf32>
    %cst_40 = arith.constant dense<0.000000e+00> : vector<4xf32>
    %118 = vector.multi_reduction <add>, %117, %cst_40 [1] : vector<4x4xf32> to vector<4xf32>
    %119 = vector.shape_cast %118 : vector<4xf32> to vector<4x1xf32>
    %120 = tpu.reciprocal %119 {approx = true} : vector<4x1xf32> -> vector<4x1xf32>
    %121 = vector.broadcast %120 : vector<4x1xf32> to vector<4x4xf32>
    %122 = arith.mulf %117, %121 : vector<4x4xf32>
    %123 = arith.truncf %122 : vector<4x4xf32> to vector<4x4xbf16>
    %cst_41 = arith.constant dense<0.000000e+00> : vector<4x32xf32>
    %124 = tpu.matmul %123, %111, %cst_41 {dimension_numbers = #tpu.dot_dimension_numbers<[1], [0], [0], [1], [0, 0, 1, 1], [], []>} : vector<4x4xbf16>, vector<4x32xbf16>, vector<4x32xf32> -> vector<4x32xf32>
    %c0_42 = arith.constant 0 : index
    %c96 = arith.constant 96 : index
    %125 = vector.load %arg21[%c0_42, %c96] : memref<4x128xf32, #tpu.memory_space<vmem>>, vector<4x32xf32>
    tpu.vector_store %arg21[%c0_42, %c96], %124 {strides = array<i32>} : memref<4x128xf32, #tpu.memory_space<vmem>>, vector<4x32xf32>,
    %c0_43 = arith.constant 0 : index
    %c0_44 = arith.constant 0 : index
    %126 = vector.load %arg21[%c0_43, %c0_44] : memref<4x128xf32, #tpu.memory_space<vmem>>, vector<4x128xf32>
    %127 = arith.truncf %126 : vector<4x128xf32> to vector<4x128xbf16>
    %c0_45 = arith.constant 0 : index
    %c0_46 = arith.constant 0 : index
    %128 = vector.load %arg8[%c0_45, %c0_46] : memref<128x128xbf16, #tpu.memory_space<vmem>>, vector<128x128xbf16>
    %cst_47 = arith.constant dense<0.000000e+00> : vector<4x128xf32>
    %129 = tpu.matmul %127, %128, %cst_47 {dimension_numbers = #tpu.dot_dimension_numbers<[1], [0], [0], [1], [0, 0, 1, 1], [], []>} : vector<4x128xbf16>, vector<128x128xbf16>, vector<4x128xf32> -> vector<4x128xf32>
    %c0_48 = arith.constant 0 : index
    %c0_49 = arith.constant 0 : index
    %130 = vector.load %arg9[%c0_48, %c0_49] : memref<1x128xf32, #tpu.memory_space<vmem>>, vector<1x128xf32>
    %131 = vector.broadcast %130 : vector<1x128xf32> to vector<4x128xf32>
    %132 = arith.addf %129, %131 : vector<4x128xf32>
    %133 = arith.addf %8, %132 : vector<4x128xf32>
    %c0_50 = arith.constant 0 : index
    %c0_51 = arith.constant 0 : index
    %134 = vector.load %arg10[%c0_50, %c0_51] : memref<1x128xf32, #tpu.memory_space<vmem>>, vector<1x128xf32>
    %c0_52 = arith.constant 0 : index
    %c0_53 = arith.constant 0 : index
    %135 = vector.load %arg11[%c0_52, %c0_53] : memref<1x128xf32, #tpu.memory_space<vmem>>, vector<1x128xf32>
    %cst_54 = arith.constant dense<0.000000e+00> : vector<4xf32>
    %136 = vector.multi_reduction <add>, %133, %cst_54 [1] : vector<4x128xf32> to vector<4xf32>
    %137 = vector.shape_cast %136 : vector<4xf32> to vector<4x1xf32>
    %cst_55 = arith.constant 1.280000e+02 : f32
    %138 = vector.broadcast %cst_55 : f32 to vector<4x1xf32>
    %139 = arith.divf %137, %138 : vector<4x1xf32>
    %140 = vector.broadcast %139 : vector<4x1xf32> to vector<4x128xf32>
    %141 = arith.subf %133, %140 : vector<4x128xf32>
    %142 = vector.broadcast %139 : vector<4x1xf32> to vector<4x128xf32>
    %143 = arith.subf %133, %142 : vector<4x128xf32>
    %144 = arith.mulf %141, %143 : vector<4x128xf32>
    %cst_56 = arith.constant dense<0.000000e+00> : vector<4xf32>
    %145 = vector.multi_reduction <add>, %144, %cst_56 [1] : vector<4x128xf32> to vector<4xf32>
    %146 = vector.shape_cast %145 : vector<4xf32> to vector<4x1xf32>
    %cst_57 = arith.constant 1.280000e+02 : f32
    %147 = vector.broadcast %cst_57 : f32 to vector<4x1xf32>
    %148 = arith.divf %146, %147 : vector<4x1xf32>
    %149 = vector.broadcast %139 : vector<4x1xf32> to vector<4x128xf32>
    %150 = arith.subf %133, %149 : vector<4x128xf32>
    %cst_58 = arith.constant 9.99999974E-6 : f32
    %151 = vector.broadcast %cst_58 : f32 to vector<4x1xf32>
    %152 = arith.addf %148, %151 : vector<4x1xf32>
    %153 = math.rsqrt %152 : vector<4x1xf32>
    %154 = vector.broadcast %153 : vector<4x1xf32> to vector<4x128xf32>
    %155 = arith.mulf %150, %154 : vector<4x128xf32>
    %156 = vector.broadcast %134 : vector<1x128xf32> to vector<4x128xf32>
    %157 = arith.mulf %155, %156 : vector<4x128xf32>
    %158 = vector.broadcast %135 : vector<1x128xf32> to vector<4x128xf32>
    %159 = arith.addf %157, %158 : vector<4x128xf32>
    %160 = arith.truncf %159 : vector<4x128xf32> to vector<4x128xbf16>
    %c0_59 = arith.constant 0 : index
    %c0_60 = arith.constant 0 : index
    %161 = vector.load %arg12[%c0_59, %c0_60] : memref<128x256xbf16, #tpu.memory_space<vmem>>, vector<128x256xbf16>
    %cst_61 = arith.constant dense<0.000000e+00> : vector<4x256xf32>
    %162 = tpu.matmul %160, %161, %cst_61 {dimension_numbers = #tpu.dot_dimension_numbers<[1], [0], [0], [1], [0, 0, 1, 1], [], []>} : vector<4x128xbf16>, vector<128x256xbf16>, vector<4x256xf32> -> vector<4x256xf32>
    %c0_62 = arith.constant 0 : index
    %c0_63 = arith.constant 0 : index
    %163 = vector.load %arg13[%c0_62, %c0_63] : memref<1x256xf32, #tpu.memory_space<vmem>>, vector<1x256xf32>
    %164 = vector.broadcast %163 : vector<1x256xf32> to vector<4x256xf32>
    %165 = arith.addf %162, %164 : vector<4x256xf32>
    %166 = arith.mulf %165, %165 : vector<4x256xf32>
    %167 = arith.mulf %165, %166 : vector<4x256xf32>
    %cst_64 = arith.constant 4.471500e-02 : f32
    %168 = vector.broadcast %cst_64 : f32 to vector<4x256xf32>
    %169 = arith.mulf %168, %167 : vector<4x256xf32>
    %170 = arith.addf %165, %169 : vector<4x256xf32>
    %cst_65 = arith.constant 0.797884583 : f32
    %171 = vector.broadcast %cst_65 : f32 to vector<4x256xf32>
    %172 = arith.mulf %171, %170 : vector<4x256xf32>
    %173 = math.tanh %172 : vector<4x256xf32>
    %cst_66 = arith.constant 1.000000e+00 : f32
    %174 = vector.broadcast %cst_66 : f32 to vector<4x256xf32>
    %175 = arith.addf %174, %173 : vector<4x256xf32>
    %cst_67 = arith.constant 5.000000e-01 : f32
    %176 = vector.broadcast %cst_67 : f32 to vector<4x256xf32>
    %177 = arith.mulf %176, %175 : vector<4x256xf32>
    %178 = arith.mulf %165, %177 : vector<4x256xf32>
    %179 = arith.truncf %178 : vector<4x256xf32> to vector<4x256xbf16>
    %c0_68 = arith.constant 0 : index
    %c0_69 = arith.constant 0 : index
    %180 = vector.load %arg14[%c0_68, %c0_69] : memref<256x128xbf16, #tpu.memory_space<vmem>>, vector<256x128xbf16>
    %cst_70 = arith.constant dense<0.000000e+00> : vector<4x128xf32>
    %181 = tpu.matmul %179, %180, %cst_70 {dimension_numbers = #tpu.dot_dimension_numbers<[1], [0], [0], [1], [0, 0, 1, 1], [], []>} : vector<4x256xbf16>, vector<256x128xbf16>, vector<4x128xf32> -> vector<4x128xf32>
    %c0_71 = arith.constant 0 : index
    %c0_72 = arith.constant 0 : index
    %182 = vector.load %arg15[%c0_71, %c0_72] : memref<1x128xf32, #tpu.memory_space<vmem>>, vector<1x128xf32>
    %183 = vector.broadcast %182 : vector<1x128xf32> to vector<4x128xf32>
    %184 = arith.addf %181, %183 : vector<4x128xf32>
    %185 = arith.addf %133, %184 : vector<4x128xf32>
    %c0_73 = arith.constant 0 : index
    %c0_74 = arith.constant 0 : index
    %186 = vector.load %arg16[%c0_73, %c0_74] : memref<1x128xf32, #tpu.memory_space<vmem>>, vector<1x128xf32>
    %c0_75 = arith.constant 0 : index
    %c0_76 = arith.constant 0 : index
    %187 = vector.load %arg17[%c0_75, %c0_76] : memref<1x128xf32, #tpu.memory_space<vmem>>, vector<1x128xf32>
    %cst_77 = arith.constant dense<0.000000e+00> : vector<4xf32>
    %188 = vector.multi_reduction <add>, %185, %cst_77 [1] : vector<4x128xf32> to vector<4xf32>
    %189 = vector.shape_cast %188 : vector<4xf32> to vector<4x1xf32>
    %cst_78 = arith.constant 1.280000e+02 : f32
    %190 = vector.broadcast %cst_78 : f32 to vector<4x1xf32>
    %191 = arith.divf %189, %190 : vector<4x1xf32>
    %192 = vector.broadcast %191 : vector<4x1xf32> to vector<4x128xf32>
    %193 = arith.subf %185, %192 : vector<4x128xf32>
    %194 = vector.broadcast %191 : vector<4x1xf32> to vector<4x128xf32>
    %195 = arith.subf %185, %194 : vector<4x128xf32>
    %196 = arith.mulf %193, %195 : vector<4x128xf32>
    %cst_79 = arith.constant dense<0.000000e+00> : vector<4xf32>
    %197 = vector.multi_reduction <add>, %196, %cst_79 [1] : vector<4x128xf32> to vector<4xf32>
    %198 = vector.shape_cast %197 : vector<4xf32> to vector<4x1xf32>
    %cst_80 = arith.constant 1.280000e+02 : f32
    %199 = vector.broadcast %cst_80 : f32 to vector<4x1xf32>
    %200 = arith.divf %198, %199 : vector<4x1xf32>
    %201 = vector.broadcast %191 : vector<4x1xf32> to vector<4x128xf32>
    %202 = arith.subf %185, %201 : vector<4x128xf32>
    %cst_81 = arith.constant 9.99999974E-6 : f32
    %203 = vector.broadcast %cst_81 : f32 to vector<4x1xf32>
    %204 = arith.addf %200, %203 : vector<4x1xf32>
    %205 = math.rsqrt %204 : vector<4x1xf32>
    %206 = vector.broadcast %205 : vector<4x1xf32> to vector<4x128xf32>
    %207 = arith.mulf %202, %206 : vector<4x128xf32>
    %208 = vector.broadcast %186 : vector<1x128xf32> to vector<4x128xf32>
    %209 = arith.mulf %207, %208 : vector<4x128xf32>
    %210 = vector.broadcast %187 : vector<1x128xf32> to vector<4x128xf32>
    %211 = arith.addf %209, %210 : vector<4x128xf32>
    %212 = arith.truncf %211 : vector<4x128xf32> to vector<4x128xbf16>
    %c0_82 = arith.constant 0 : index
    %c0_83 = arith.constant 0 : index
    %213 = vector.load %arg18[%c0_82, %c0_83] : memref<128x128xbf16, #tpu.memory_space<vmem>>, vector<128x128xbf16>
    %cst_84 = arith.constant dense<0.000000e+00> : vector<4x128xf32>
    %214 = tpu.matmul %212, %213, %cst_84 {dimension_numbers = #tpu.dot_dimension_numbers<[1], [0], [0], [1], [0, 0, 1, 1], [], []>} : vector<4x128xbf16>, vector<128x128xbf16>, vector<4x128xf32> -> vector<4x128xf32>
    %c0_85 = arith.constant 0 : index
    %c0_86 = arith.constant 0 : index
    %215 = vector.load %arg19[%c0_85, %c0_86] : memref<1x128xf32, #tpu.memory_space<vmem>>, vector<1x128xf32>
    %216 = vector.broadcast %215 : vector<1x128xf32> to vector<4x128xf32>
    %217 = arith.addf %214, %216 : vector<4x128xf32>
    %c0_87 = arith.constant 0 : index
    %c0_88 = arith.constant 0 : index
    %218 = vector.load %arg20[%c0_87, %c0_88] : memref<4x128xf32, #tpu.memory_space<vmem>>, vector<4x128xf32>
    tpu.vector_store %arg20[%c0_87, %c0_88], %217 {strides = array<i32>} : memref<4x128xf32, #tpu.memory_space<vmem>>, vector<4x128xf32>,
    return
  }
}

</mosaic_0001>

<bundles_post_ra>
// kernel: tpu_custom_call.1
= control target key start
LH: loop header
LB: loop body
LE: loop exit
PB: predicated region body
PF: predicated region fallthrough
CT: control target
= control target key end

     0   :  { %s2494_s0 = inlined_call_operand.hbm [shape: f32[4,192], index: 0, kind: input, shape index: {}]   ;;  %s2495_s1 = inlined_call_operand.hbm [shape: f32[4,128], index: 1, kind: input, shape index: {}]   ;;  %s2496_s2 = inlined_call_operand.hbm [shape: bf16[192,128], index: 2, kind: input, shape index: {}]   ;;  %s2497_s3 = inlined_call_operand.hbm [shape: f32[1,128], index: 3, kind: input, shape index: {}]   ;;  %s2498_s4 = inlined_call_operand.hbm [shape: f32[1,128], index: 4, kind: input, shape index: {}]   ;;  %s2499_s5 = inlined_call_operand.hbm [shape: f32[1,128], index: 5, kind: input, shape index: {}]   ;;  %s2500_s6 = inlined_call_operand.hbm [shape: bf16[128,384], index: 6, kind: input, shape index: {}]   ;;  %s2501_s7 = inlined_call_operand.vmem [shape: f32[1,384], index: 7, kind: input, shape index: {}]   ;;  %s2502_s8 = inlined_call_operand.hbm [shape: bf16[128,128], index: 8, kind: input, shape index: {}]   ;;  %s2503_s9 = inlined_call_operand.vmem [shape: f32[1,128], index: 9, kind: input, shape index: {}]   ;;  %s2504_s10 = inlined_call_operand.vmem [shape: f32[1,128], index: 10, kind: input, shape index: {}]   ;;  %s2505_s11 = inlined_call_operand.vmem [shape: f32[1,128], index: 11, kind: input, shape index: {}]   ;;  %s2506_s12 = inlined_call_operand.hbm [shape: bf16[128,256], index: 12, kind: input, shape index: {}]   ;;  %s2507_s13 = inlined_call_operand.vmem [shape: f32[1,256], index: 13, kind: input, shape index: {}]   ;;  %s2508_s14 = inlined_call_operand.hbm [shape: bf16[256,128], index: 14, kind: input, shape index: {}]   ;;  %s2509_s15 = inlined_call_operand.vmem [shape: f32[1,128], index: 15, kind: input, shape index: {}]   ;;  %s2510_s16 = inlined_call_operand.vmem [shape: f32[1,128], index: 16, kind: input, shape index: {}]   ;;  %s2511_s17 = inlined_call_operand.vmem [shape: f32[1,128], index: 17, kind: input, shape index: {}]   ;;  %s2512_s18 = inlined_call_operand.hbm [shape: bf16[128,128], index: 18, kind: input, shape index: {}]   ;;  %s2513_s19 = inlined_call_operand.vmem [shape: f32[1,128], index: 19, kind: input, shape index: {}]   ;;  %s2514_s20 = inlined_call_operand.hbm [shape: f32[4,128], index: 20, kind: output, shape index: {}]  }
   0x1   :  { %2515 = sst [smem:[#allocation29_spill]] %s2494_s0 }
   0x2   :  { %2516 = sst [smem:[#allocation30_spill]] %s2495_s1 }
   0x3   :  { %2517 = sst [smem:[#allocation31_spill]] %s2496_s2 }
   0x4   :  { %2518 = sst [smem:[#allocation32_spill]] %s2497_s3 }
   0x5   :  { %2519 = sst [smem:[#allocation33_spill]] %s2498_s4 }
   0x6   :  { %2520 = sst [smem:[#allocation34_spill]] %s2514_s20 }
   0x7   :  { %25 = vsyncpa [#allocation4], 0 }
   0x8   :  { %26 = vsyncpa [#allocation7], 0 }
   0x9   :  { %27 = vsyncpa [#allocation10], 0 }
   0xa   :  { %28 = vsyncpa [#allocation13], 0 }
   0xb   :  { %29 = vsyncpa [#allocation16], 0 }
   0xc   :  { %30 = vsyncpa [#allocation19], 0  ;;  %s2521_s23 = sld [smem:[#allocation30_spill]] }
  0x12   :  { %s48_s24 = sshll.u32 %s2521_s23, 4  ;;  %s49_s24 = int_to_ptr.hbm [resolvable:$true] %s48_s24 }
  0x13   :  { %31 = vsyncpa [#allocation5], 0  ;;  %s2217_s2 = smov [#allocation6]   ;;  %s2522_s27 = sld [smem:[#allocation32_spill]] }
  0x14   :  { %s50_s25 = sshll.u32 %s2217_s2, 4  ;;  %s2218_s4 = smov [#allocation9]   ;;  %s51_s25 = int_to_ptr.vmem [resolvable:$true] %s50_s25 }
  0x15   :  { %53 = dma.hbm_to_vmem [thread:$0]  %s49_s24, 64, %s51_s25, [#allocation7]  }
  0x16   :  { %s74_s29 = sshll.u32 %s2218_s4, 4  ;;  %s94_s21 = sshll.u32 %s2499_s5, 4  ;;  %s75_s29 = int_to_ptr.vmem [resolvable:$true] %s74_s29  ;;  %s95_s21 = int_to_ptr.hbm [resolvable:$true] %s94_s21 }
  0x17   :  { %s2219_s1 = smov [#allocation12]   ;;  %s119_s20 = sshll.u32 %s2502_s8, 4  ;;  %s120_s20 = int_to_ptr.hbm [resolvable:$true] %s119_s20 }
  0x18   :  { %s96_s22 = sshll.u32 %s2219_s1, 4  ;;  %s2220_s24 = smov [#allocation15]   ;;  %s97_s22 = int_to_ptr.vmem [resolvable:$true] %s96_s22 }
  0x19   :  { %s72_s28 = sshll.u32 %s2522_s27, 4  ;;  %s121_s25 = sshll.u32 %s2220_s24, 4  ;;  %s73_s28 = int_to_ptr.hbm [resolvable:$true] %s72_s28  ;;  %s122_s25 = int_to_ptr.vmem [resolvable:$true] %s121_s25 }
  0x1a   :  { %77 = dma.hbm_to_vmem [thread:$0]  %s73_s28, 16, %s75_s29, [#allocation10]  }
  0x1b   :  { %99 = dma.hbm_to_vmem [thread:$0]  %s95_s21, 16, %s97_s22, [#allocation13]  }
  0x1c   :  { %s153_s27 = sshll.u32 %s2508_s14, 4  ;;  %s2221_s5 = smov 64   ;;  %s154_s27 = int_to_ptr.hbm [resolvable:$true] %s153_s27 }
  0x1d   :  { %s2222_s4 = smov 4   ;;  %s2523_s30 = sld [smem:[#allocation29_spill]] }
  0x1e   :  { %127 = dma.hbm_to_vmem [thread:$0]  %s120_s20, 1024, %s122_s25, [#allocation16], %s2221_s5, %s2221_s5, %s2222_s4  }
  0x1f   :  { %s2223_s0 = smov [#allocation18]   ;;  %s2224_s14 = smov [#allocation3]  }
  0x20   :  { %s155_s21 = sshll.u32 %s2223_s0, 4  ;;  %s39_s1 = sshll.u32 %s2224_s14, 4  ;;  %s156_s21 = int_to_ptr.vmem [resolvable:$true] %s155_s21  ;;  %s40_s1 = int_to_ptr.vmem [resolvable:$true] %s39_s1 }
  0x21   :  { %161 = dma.hbm_to_vmem [thread:$0]  %s154_s27, 2048, %s156_s21, [#allocation19], %s2221_s5, %s2221_s5, %s2222_s4  }
  0x22   :  { %s2524_s2 = sld [smem:[#allocation31_spill]]  ;;  %s2225_s28 = smov [#allocation8]  }
  0x23   :  { %s37_s8 = sshll.u32 %s2523_s30, 4  ;;  %s2525_s3 = sld [smem:[#allocation33_spill]]  ;;  %s38_s8 = int_to_ptr.hbm [resolvable:$true] %s37_s8 }
  0x24   :  { %42 = dma.hbm_to_vmem [thread:$0]  %s38_s8, 128, %s40_s1, [#allocation4]  }
  0x25   :  { %s60_s29 = sshll.u32 %s2225_s28, 4  ;;  %s2226_s27 = smov [#allocation11]   ;;  %s61_s29 = int_to_ptr.vmem [resolvable:$true] %s60_s29 }
  0x26   :  { %s85_s30 = sshll.u32 %s2226_s27, 4  ;;  %s104_s14 = sshll.u32 %s2500_s6, 4  ;;  %s86_s30 = int_to_ptr.vmem [resolvable:$true] %s85_s30  ;;  %s105_s14 = int_to_ptr.hbm [resolvable:$true] %s104_s14 }
  0x27   :  { %s2227_s8 = smov [#allocation14]   ;;  %s2228_s20 = smov 192  }
  0x28   :  { %s58_s24 = sshll.u32 %s2524_s2, 4  ;;  %s106_s1 = sshll.u32 %s2227_s8, 4  ;;  %s59_s24 = int_to_ptr.hbm [resolvable:$true] %s58_s24  ;;  %s107_s1 = int_to_ptr.vmem [resolvable:$true] %s106_s1 }
  0x29   :  { %s83_s26 = sshll.u32 %s2525_s3, 4  ;;  %s138_s2 = sshll.u32 %s2506_s12, 4  ;;  %s84_s26 = int_to_ptr.hbm [resolvable:$true] %s83_s26  ;;  %s139_s2 = int_to_ptr.hbm [resolvable:$true] %s138_s2 }
  0x2a   :  { %66 = dma.hbm_to_vmem [thread:$0]  %s59_s24, 1536, %s61_s29, [#allocation7], %s2221_s5, %s2221_s5, %s2222_s4  }
  0x2b   :  { %88 = dma.hbm_to_vmem [thread:$0]  %s84_s26, 16, %s86_s30, [#allocation10]  }
  0x2c   :  { %s2229_s25 = smov 12   ;;  %s2230_s24 = smov [#allocation17]  }
  0x2d   :  { %112 = dma.hbm_to_vmem [thread:$0]  %s105_s14, 3072, %s107_s1, [#allocation13], %s2228_s20, %s2228_s20, %s2229_s25  }
  0x2e   :  { %s140_s3 = sshll.u32 %s2230_s24, 4  ;;  %s2231_s28 = smov 128   ;;  %s141_s3 = int_to_ptr.vmem [resolvable:$true] %s140_s3 }
  0x2f   :  { %s2232_s29 = smov 8   ;;  %s172_s26 = sshll.u32 %s2512_s18, 4  ;;  %s173_s26 = int_to_ptr.hbm [resolvable:$true] %s172_s26 }
  0x30   :  { %146 = dma.hbm_to_vmem [thread:$0]  %s139_s2, 2048, %s141_s3, [#allocation16], %s2231_s28, %s2231_s28, %s2232_s29  }
  0x31   :  { %s2233_s30 = smov [#allocation20]  }
  0x32   :  { %s174_s0 = sshll.u32 %s2233_s30, 4  ;;  %s175_s0 = int_to_ptr.vmem [resolvable:$true] %s174_s0 }
  0x33   :  { %180 = dma.hbm_to_vmem [thread:$0]  %s173_s26, 1024, %s175_s0, [#allocation19], %s2221_s5, %s2221_s5, %s2222_s4  }
  0x34   :  { %2203 = dma.done.wait [#allocation4], 128  }
  0x35   :  { %2204 = vsyncadd [#allocation4], 4294967168 }
  0x36   :  { %2205 = dma.done.wait [#allocation7], 1600  }
  0x37   :  { %2206 = vsyncadd [#allocation7], 4294965696 }
  0x38   :  { %2207 = dma.done.wait [#allocation10], 32  }
  0x39   :  { %2208 = vsyncadd [#allocation10], 4294967264 }
  0x3a   :  { %2209 = dma.done.wait [#allocation13], 3088  }
  0x3b   :  { %2210 = vsyncadd [#allocation13], 4294964208 }
  0x3c   :  { %2211 = dma.done.wait [#allocation16], 3072  }
  0x3d   :  { %2212 = vsyncadd [#allocation16], 4294964224 }
  0x3e   :  { %2213 = dma.done.wait [#allocation19], 3072  }
  0x3f   :  { %2214 = vsyncadd [#allocation19], 4294964224  ;;  %v1779_v0 = vld [vmem:[#allocation8 + $0x38] sm:$0xff]  ;;  %v1778_v2 = vld [vmem:[#allocation8 + $0x30] sm:$0xff]  ;;  %vm337_vm0 = vcmask 523264   ;;  %vm371_vm1 = vcmask 1043456  }
  0x40   :  { %v1783_v1 = vld [vmem:[#allocation8 + $0x58] sm:$0xff]  ;;  %341 = vmatpush.bf16.msra.mxu0 %v1779_v0  ;;  %v1782_v3 = vld [vmem:[#allocation8 + $0x50] sm:$0xff]  ;;  %v1777_v5 = vld [vmem:[#allocation8 + $0x28] sm:$0xff]  ;;  %v2234_v27 = vmov 128.0   ;;  %vm658_vm6 = vcmask 1041408   ;;  %vm621_vm7 = vcmask 261120  }
  0x41   :  { %358 = vmatpush.bf16.msra.mxu3 %v1783_v1  ;;  %v228_v4 = vld [vmem:[#allocation3] sm:$0xff]  ;;  %v1781_v6 = vld [vmem:[#allocation8 + $0x48] sm:$0xff]  ;;  %v1776_v7 = vld [vmem:[#allocation8 + $0x20] sm:$0xff]  ;;  %1887 = vrcp.f32 %v2234_v27  ;;  %s2236_s4 = smov 32   ;;  %vm641_vm8 = vcmask 27648   ;;  %vm654_vm9 = vcmask 31744  }
  0x42   :  { %230 = vst [vmem:[#allocation1] ss:$2 sm:$0xff] %v228_v4  ;;  %v1780_v8 = vld [vmem:[#allocation8 + $0x40] sm:$0xff]  ;;  %v1775_v11 = vld [vmem:[#allocation8 + $0x18] sm:$0xff]  ;;  %v1774_v12 = vld [vmem:[#allocation8 + $0x10] sm:$0xff]  ;;  %vm675_vm10 = vcmask 257024  }
  0x43   :  { %v1773_v13 = vld [vmem:[#allocation8 + $0x8] sm:$0xff]  ;;  %v1772_v14 = vld [vmem:[#allocation8] sm:$0xff]  ;;  %v367_v22 = vld [vmem:[#allocation6] sm:$0xf]  ;;  %vm740_vm11 = vcmask 519424   ;;  %vm802_vm12 = vcmask 781824  }
  0x44   :  { %342 = vmatpush.bf16.msra.mxu0 %v1778_v2  ;;  %v1877_v18 = vld [vmem:[#allocation9] ss:$0 sm:$0xff]  ;;  %v1562_v28 = vld [vmem:[#allocation14 + $0xa8] sm:$0xf]  ;;  %v1806_v29 = vld [vmem:[#allocation14 + $0xb0] sm:$0xf0] }
  0x45   :  { %359 = vmatpush.bf16.msra.mxu3 %v1782_v3  ;;  %v1805_v30 = vld [vmem:[#allocation14 + $0xac] sm:$0xf]  ;;  %v1563_v31 = vor.u32 %v1806_v29, %v1562_v28  ;;  %v1564_v32 = vld [vmem:[#allocation14 + $0xb4] sm:$0xf0]  ;;  %v1570_v33 = vld [vmem:[#allocation14 + $0xb0] sm:$0xf] }
  0x46   :  { %v1807_v34 = vld [vmem:[#allocation14 + $0xb8] sm:$0xf0]  ;;  %v1567_v35 = vor.u32 %v1805_v30, %v1564_v32  ;;  %v1550_v48 = vld [vmem:[#allocation14 + $0x90] sm:$0xf]  ;;  %v1802_v50 = vld [vmem:[#allocation14 + $0x94] sm:$0xf] }
  0x47   :  { %v1571_v36 = vor.u32 %v1807_v34, %v1570_v33  ;;  %v1888_v37 = vpop.eup %1887  ;;  %578 = vmatpush.bf16.msra.mxu2 %v1563_v31  ;;  %v1803_v49 = vld [vmem:[#allocation14 + $0x98] sm:$0xf0]  ;;  %v1552_v52 = vld [vmem:[#allocation14 + $0x9c] sm:$0xf0]  ;;  %v1558_v53 = vld [vmem:[#allocation14 + $0x98] sm:$0xf] }
  0x48   :  { %343 = vmatpush.bf16.msra.mxu0 %v1777_v5  ;;  %v376_v38 = vmul.f32 128.0, %v1888_v37  ;;  %vm380_vm2 = vweird.f32 %v1888_v37  ;;  %v1551_v51 = vor.u32 %v1803_v49, %v1550_v48  ;;  %v1804_v54 = vld [vmem:[#allocation14 + $0xa0] sm:$0xf0]  ;;  %v1555_v55 = vor.u32 %v1802_v50, %v1552_v52  ;;  %v1538_v57 = vld [vmem:[#allocation14 + $0x78] sm:$0xf]  ;;  %s2237_s3 = smov [#allocation21]  }
  0x49   :  { %360 = vmatpush.bf16.msra.mxu3 %v1781_v6  ;;  %v232_v9 = vld.sshfl [vmem:[#allocation1 + $0x8] sm:$0xff pattern:$0x75316420]  ;;  %v231_v15 = vld.sshfl [vmem:[#allocation1] sm:$0xff pattern:$0x75316420]  ;;  %604 = vmatpush.bf16.msra.mxu1 %v1571_v36  ;;  %v1559_v56 = vor.u32 %v1804_v54, %v1558_v53 }
  0x4a   :  { %v236_v10 = vpack.c.bf16 %v232_v9, %v232_v9  ;;  %v235_v16 = vpack.c.bf16 %v231_v15, %v231_v15  ;;  %v377_v39 = vsub.f32 1.0, %v376_v38  ;;  %v1800_v58 = vld [vmem:[#allocation14 + $0x80] sm:$0xf0]  ;;  %v1799_v59 = vld [vmem:[#allocation14 + $0x7c] sm:$0xf]  ;;  %vm864_vm13 = vcmask 1044224  }
  0x4b   :  { %579 = vmatpush.bf16.msra.mxu2 %v1551_v51  ;;  %v1539_v60 = vor.u32 %v1800_v58, %v1538_v57  ;;  %v1540_v61 = vld [vmem:[#allocation14 + $0x84] sm:$0xf0]  ;;  %v1546_v62 = vld [vmem:[#allocation14 + $0x80] sm:$0xf]  ;;  %v1801_v63 = vld [vmem:[#allocation14 + $0x88] sm:$0xf0] }
  0x4c   :  { %344 = vmatpush.bf16.msra.mxu0 %v1776_v7  ;;  %v378_v40 = vmul.f32 %v1888_v37, %v377_v39  ;;  %v1543_v0 = vor.u32 %v1799_v59, %v1540_v61  ;;  %v1547_v1 = vor.u32 %v1801_v63, %v1546_v62  ;;  %v1526_v2 = vld [vmem:[#allocation14 + $0x60] sm:$0xf]  ;;  %v1797_v3 = vld [vmem:[#allocation14 + $0x68] sm:$0xf0]  ;;  %v1796_v4 = vld [vmem:[#allocation14 + $0x64] sm:$0xf] }
  0x4d   :  { %361 = vmatpush.bf16.msra.mxu3 %v1780_v8  ;;  %605 = vmatpush.bf16.msra.mxu1 %v1559_v56  ;;  %v1527_v5 = vor.u32 %v1797_v3, %v1526_v2  ;;  %v1528_v6 = vld [vmem:[#allocation14 + $0x6c] sm:$0xf0]  ;;  %v1534_v7 = vld [vmem:[#allocation14 + $0x68] sm:$0xf]  ;;  %v1798_v8 = vld [vmem:[#allocation14 + $0x70] sm:$0xf0] }
  0x4e   :  { %v379_v41 = vadd.f32 %v1888_v37, %v378_v40  ;;  %v1531_v9 = vor.u32 %v1796_v4, %v1528_v6  ;;  %v1516_v15 = vld [vmem:[#allocation14 + $0x54] sm:$0xf0]  ;;  %v1792_v27 = vld [vmem:[#allocation14 + $0x40] sm:$0xf0]  ;;  %v1787_v32 = vld [vmem:[#allocation14 + $0x1c] sm:$0xf] }
  0x4f   :  { %580 = vmatpush.bf16.msra.mxu2 %v1539_v60  ;;  %v1490_v30 = vld [vmem:[#allocation14 + $0x18] sm:$0xf]  ;;  %v1788_v31 = vld [vmem:[#allocation14 + $0x20] sm:$0xf0]  ;;  %v1492_v34 = vld [vmem:[#allocation14 + $0x24] sm:$0xf0] }
  0x50   :  { %1475 = vmatmul.msk.bf16.vlgmr.msra.gmra.mxu3 %vm337_vm0, %v236_v10  ;;  %345 = vmatpush.bf16.msra.mxu0 %v1775_v11  ;;  %v2392_v42 = vsel %vm380_vm2, %v1888_v37, %v379_v41  ;;  %v1535_v10 = vor.u32 %v1798_v8, %v1534_v7  ;;  %v1514_v11 = vld [vmem:[#allocation14 + $0x48] sm:$0xf]  ;;  %v1491_v33 = vor.u32 %v1788_v31, %v1490_v30  ;;  %v1789_v36 = vld [vmem:[#allocation14 + $0x28] sm:$0xf0]  ;;  %v1478_v39 = vld [vmem:[#allocation14] sm:$0xf] }
  0x51   :  { %591 = vmatpush.bf16.msrb.mxu3 %v1567_v35  ;;  %606 = vmatpush.bf16.msra.mxu1 %v1547_v1  ;;  %v1498_v35 = vld [vmem:[#allocation14 + $0x20] sm:$0xf]  ;;  %v1495_v37 = vor.u32 %v1787_v32, %v1492_v34  ;;  %v1785_v40 = vld [vmem:[#allocation14 + $0x8] sm:$0xf0]  ;;  %v1784_v41 = vld [vmem:[#allocation14 + $0x4] sm:$0xf] }
  0x52   :  { %v1499_v38 = vor.u32 %v1789_v36, %v1498_v35  ;;  %v1878_v59 = vld [vmem:[#allocation11] ss:$0 sm:$0xff]  ;;  %v1879_v62 = vld [vmem:[#allocation12] ss:$0 sm:$0xff]  ;;  %v442_v2 = vld [vmem:[%s2501_s7] sm:$0x7] }
  0x53   :  { %581 = vmatpush.bf16.msra.mxu2 %v1527_v5  ;;  %v446_v3 = vperm.slane %v442_v2, 2  ;;  %v444_v6 = vperm.slane %v442_v2, 0  ;;  %v445_v7 = vperm.slane %v442_v2, 1  ;;  %s2235_s7 = smov 96   ;;  %s1410_s28 = sshll.u32 %s2237_s3, 4  ;;  %s1411_s28 = int_to_ptr.vmem [resolvable:$true] %s1410_s28 }
  0x54   :  { %346 = vmatpush.bf16.msra.mxu0 %v1774_v12  ;;  %v1794_v12 = vld [vmem:[#allocation14 + $0x50] sm:$0xf0]  ;;  %s2526_s27 = sld [smem:[#allocation34_spill]] }
  0x55   :  { %592 = vmatpush.bf16.msrb.mxu3 %v1555_v55  ;;  %607 = vmatpush.bf16.msra.mxu1 %v1535_v10 }
  0x58   :  { %347 = vmatpush.bf16.msra.mxu0 %v1773_v13  ;;  %v1793_v13 = vld [vmem:[#allocation14 + $0x4c] sm:$0xf] }
  0x59   :  { %593 = vmatpush.bf16.msrb.mxu3 %v1543_v0 }
  0x5c   :  { %348 = vmatpush.bf16.msra.mxu0 %v1772_v14  ;;  %v1515_v14 = vor.u32 %v1794_v12, %v1514_v11 }
  0x5d   :  { %594 = vmatpush.bf16.msrb.mxu3 %v1531_v9 }
  0x5e   :  { %582 = vmatpush.bf16.msra.mxu2 %v1515_v14 }
  0x5f   :  { %349 = vmatmul.bf16.vlgmr.msra.gmra.mxu0 %v235_v16  ;;  %v1522_v16 = vld [vmem:[#allocation14 + $0x50] sm:$0xf] }
  0xd3   :  { %v363_v17 = vpop.f32.mrf.mxu3 }
  0xdb   :  { %v365_v19 = vpop.f32.mrf.mxu3 }
  0xdc   :  { %v350_v20 = vpop.f32.mrf.mxu0 }
  0xdd   :  { %v351_v21 = vadd.f32 %v1877_v18, %v350_v20  ;;  %v1519_v18 = vor.u32 %v1793_v13, %v1516_v15  ;;  %v1502_v20 = vld [vmem:[#allocation14 + $0x30] sm:$0xf] }
  0xdf   :  { %v364_v23 = vadd.f32 %v363_v17, %v351_v21  ;;  %v1795_v17 = vld [vmem:[#allocation14 + $0x58] sm:$0xf0]  ;;  %595 = vmatpush.bf16.msrb.mxu3 %v1519_v18 }
  0xe0   :  { %v1523_v19 = vor.u32 %v1795_v17, %v1522_v16  ;;  %v1791_v21 = vld [vmem:[#allocation14 + $0x38] sm:$0xf0] }
  0xe1   :  { %v2388_v24 = vadd.f32 %v367_v22, %v364_v23  ;;  %v1790_v22 = vld [vmem:[#allocation14 + $0x34] sm:$0xf]  ;;  %v1503_v23 = vor.u32 %v1791_v21, %v1502_v20 }
  0xe2   :  { %608 = vmatpush.bf16.msra.mxu1 %v1523_v19 }
  0xe3   :  { %v372_v25 = vsel %vm371_vm1, %v2388_v24, 0.0  ;;  %583 = vmatpush.bf16.msra.mxu2 %v1503_v23 }
  0xe4   :  { %v352_v26 = vpop.f32.mrf.mxu0  ;;  %373 = vadd.xlane.f32.xlu0 %v372_v25  ;;  %v1504_v25 = vld [vmem:[#allocation14 + $0x3c] sm:$0xf0] }
  0xe5   :  { %v1510_v26 = vld [vmem:[#allocation14 + $0x38] sm:$0xf]  ;;  %v1507_v28 = vor.u32 %v1790_v22, %v1504_v25 }
  0xe6   :  { %v1511_v29 = vor.u32 %v1792_v27, %v1510_v26 }
  0xe7   :  { %596 = vmatpush.bf16.msrb.mxu3 %v1507_v28  ;;  %584 = vmatpush.bf16.msra.mxu2 %v1491_v33 }
  0xe8   :  { %609 = vmatpush.bf16.msra.mxu1 %v1511_v29 }
  0xeb   :  { %597 = vmatpush.bf16.msrb.mxu3 %v1495_v37 }
  0xec   :  { %610 = vmatpush.bf16.msra.mxu1 %v1499_v38 }
 0x157   :  { %v374_v43 = vpop.xlane.xlu0 %373 }
 0x158   :  { %v382_v44 = vmul.f32 %v2392_v42, %v374_v43  ;;  %v1479_v43 = vor.u32 %v1785_v40, %v1478_v39 }
 0x15a   :  { %v2396_v45 = vsub.f32 %v2388_v24, %v382_v44  ;;  %v1480_v44 = vld [vmem:[#allocation14 + $0xc] sm:$0xf0]  ;;  %585 = vmatpush.bf16.msra.mxu2 %v1479_v43 }
 0x15b   :  { %v1483_v48 = vor.u32 %v1784_v41, %v1480_v44 }
 0x15c   :  { %v384_v46 = vmul.f32 %v2396_v45, %v2396_v45 }
 0x15d   :  { %598 = vmatpush.bf16.msrb.mxu3 %v1483_v48 }
 0x15e   :  { %v385_v47 = vsel %vm371_vm1, %v384_v46, 0.0  ;;  %v1486_v46 = vld [vmem:[#allocation14 + $0x8] sm:$0xf] }
 0x15f   :  { %386 = vadd.xlane.f32.xlu0 %v385_v47  ;;  %v1786_v47 = vld [vmem:[#allocation14 + $0x10] sm:$0xf0] }
 0x160   :  { %v1487_v49 = vor.u32 %v1786_v47, %v1486_v46 }
 0x162   :  { %611 = vmatpush.bf16.msra.mxu1 %v1487_v49 }
 0x1d2   :  { %v387_v50 = vpop.xlane.xlu0 %386 }
 0x1d3   :  { %v388_v51 = vmul.f32 %v387_v50, %v2392_v42 }
 0x1d5   :  { %v389_v52 = vadd.f32 1e-05, %v388_v51 }
 0x1d7   :  { %1889 = vrsqrt.f32 %v389_v52  ;;  %vm396_vm4 = vweird.f32 %v389_v52 }
 0x1dd   :  { %v1890_v53 = vpop.eup %1889 }
 0x1de   :  { %v391_v54 = vmul.f32 %v1890_v53, %v389_v52  ;;  %vm397_vm3 = vweird.f32 %v1890_v53 }
 0x1df   :  { %vm398_vm5 = vmor %vm396_vm4, %vm397_vm3 }
 0x1e0   :  { %v392_v55 = vmul.f32 %v1890_v53, %v391_v54 }
 0x1e2   :  { %v393_v56 = vmul.f32 0.5, %v392_v55 }
 0x1e4   :  { %v394_v57 = vsub.f32 1.5, %v393_v56 }
 0x1e6   :  { %v395_v58 = vmul.f32 %v1890_v53, %v394_v57 }
 0x1e8   :  { %v399_v60 = vsel %vm398_vm5, %v1890_v53, %v395_v58 }
 0x1e9   :  { %v400_v61 = vmul.f32 %v399_v60, %v2396_v45 }
 0x1eb   :  { %v404_v63 = vmul.f32 %v1878_v59, %v400_v61 }
 0x1ed   :  { %v408_v0 = vadd.f32 %v1879_v62, %v404_v63 }
 0x1ef   :  { %v409_v1 = vpack.c.bf16 %v408_v0, %v408_v0 }
 0x1f1   :  { %586 = vmatmul.bf16.vlgmr.msra.gmra.mxu2 %v409_v1  ;;  %599 = vmatmul.bf16.vlgmr.msrb.gmra.mxu3 %v409_v1 }
 0x1f2   :  { %612 = vmatmul.bf16.vlgmr.msra.gmra.mxu1 %v409_v1 }
 0x26f   :  { %v613_v4 = vpop.f32.mrf.mxu1 }
 0x270   :  { %v614_v5 = vadd.f32 %v613_v4, %v446_v3 }
 0x272   :  { %v2406_v8 = vpack.c.bf16 %v614_v5, %v614_v5 }
 0x274   :  { %v587_v45 = vpop.f32.mrf.mxu2  ;;  %v600_v9 = vpop.f32.mrf.mxu3  ;;  %v660_v10 = vsel %vm658_vm6, %v2406_v8, 0 }
 0x275   :  { %v588_v11 = vadd.f32 %v587_v45, %v444_v6  ;;  %v601_v12 = vadd.f32 %v600_v9, %v445_v7  ;;  %669 = vmatpush.bf16.msrb.mxu2 %v660_v10 }
 0x277   :  { %v617_v13 = vmul.f32 0.17677669, %v588_v11  ;;  %v619_v14 = vpack.c.bf16 %v601_v12, %v601_v12  ;;  %v615_v15 = vpop.f32.mrf.mxu1 }
 0x279   :  { %v618_v16 = vpack.c.bf16 %v617_v13, %v617_v13  ;;  %744 = vrot.lane.b32.xlu2 %v619_v14, %s2221_s5  ;;  %681 = vrot.lane.b32.xlu1 %v619_v14, %s2235_s7  ;;  %v626_v17 = vsel %vm621_vm7, %v619_v14, 0 }
 0x27a   :  { %635 = vmatpush.bf16.xpose.msrb.mxu0 %v626_v17 }
 0x27b   :  { %742 = vrot.lane.b32.xlu0 %v618_v16, %s2221_s5 }
 0x27c   :  { %v589_v18 = vpop.f32.mrf.mxu2  ;;  %v602_v19 = vpop.f32.mrf.mxu3 }
 0x281   :  { %806 = vrot.lane.b32.xlu2 %v619_v14, %s2236_s4  ;;  %678 = vrot.lane.b32.xlu1 %v618_v16, %s2235_s7 }
 0x282   :  { %1572 = vmatmul.msk.bf16.vlgmr.msrb.gmra.mxu0 %vm621_vm7, %v618_v16 }
 0x289   :  { %804 = vrot.lane.b32.xlu1 %v618_v16, %s2236_s4 }
 0x2d3   :  { %v745_v20 = vpop.permute.xlu2 %744 }
 0x2d4   :  { %v750_v21 = vsel %vm621_vm7, %v745_v20, 0 }
 0x2d5   :  { %759 = vmatpush.bf16.xpose.msrb.mxu1 %v750_v21 }
 0x2db   :  { %v807_v22 = vpop.permute.xlu2 %806 }
 0x2dc   :  { %v812_v26 = vsel %vm621_vm7, %v807_v22, 0 }
 0x2eb   :  { %v682_v23 = vpop.permute.xlu1 %681 }
 0x2ec   :  { %v687_v25 = vsel %vm621_vm7, %v682_v23, 0 }
 0x2ed   :  { %696 = vmatpush.bf16.xpose.msra.mxu3 %v687_v25  ;;  %v743_v27 = vpop.permute.xlu0 %742 }
 0x2ee   :  { %1576 = vmatmul.msk.bf16.vlgmr.msrb.gmra.mxu1 %vm621_vm7, %v743_v27 }
 0x2f3   :  { %v679_v28 = vpop.permute.xlu1 %678 }
 0x2f4   :  { %1574 = vmatmul.msk.bf16.vlgmr.msra.gmra.mxu3 %vm621_vm7, %v679_v28 }
 0x2f5   :  { %821 = vmatpush.bf16.xpose.msrb.mxu3 %v812_v26 }
 0x2fb   :  { %v805_v31 = vpop.permute.xlu1 %804 }
 0x2ff   :  { %v637_v29 = vpop.f32.mrf.mxu0 }
 0x300   :  { %v642_v30 = vsel %vm641_vm8, %v637_v29, -inf }
 0x301   :  { %643 = vmax.xlane.f32.xlu2 %v642_v30  ;;  %v1815_v30 = vld [vmem:[#allocation15 + $0x38] sm:$0xff] }
 0x302   :  { %936 = vmatpush.bf16.msra.mxu1 %v1815_v30 }
 0x304   :  { %1578 = vmatmul.msk.bf16.vlgmr.msrb.gmra.mxu3 %vm621_vm7, %v805_v31  ;;  %v1814_v31 = vld [vmem:[#allocation15 + $0x30] sm:$0xff] }
 0x306   :  { %937 = vmatpush.bf16.msra.mxu1 %v1814_v31  ;;  %v1624_v31 = vld [vmem:[#allocation17 + $0x18] sm:$0xf0] }
 0x307   :  { %v639_v32 = vpop.f32.mrf.mxu0 }
 0x308   :  { %v1813_v32 = vld [vmem:[#allocation15 + $0x28] sm:$0xff] }
 0x30a   :  { %938 = vmatpush.bf16.msra.mxu1 %v1813_v32  ;;  %v1614_v32 = vld [vmem:[#allocation17] sm:$0xf] }
 0x36b   :  { %v761_v33 = vpop.f32.mrf.mxu1 }
 0x36c   :  { %v765_v34 = vsel %vm641_vm8, %v761_v33, -inf }
 0x36d   :  { %766 = vmax.xlane.f32.xlu0 %v765_v34  ;;  %v1812_v34 = vld [vmem:[#allocation15 + $0x20] sm:$0xff] }
 0x36e   :  { %939 = vmatpush.bf16.msra.mxu1 %v1812_v34 }
 0x373   :  { %v763_v35 = vpop.f32.mrf.mxu1 }
 0x374   :  { %v644_v38 = vpop.xlane.xlu2 %643  ;;  %v1811_v35 = vld [vmem:[#allocation15 + $0x18] sm:$0xff] }
 0x375   :  { %v645_v39 = vsub.f32 %v637_v29, %v644_v38  ;;  %940 = vmatpush.bf16.msra.mxu1 %v1811_v35  ;;  %v1816_v35 = vld [vmem:[#allocation17 + $0x4] sm:$0xf] }
 0x377   :  { %v698_v36 = vpop.f32.mrf.mxu3  ;;  %v646_v41 = vmul.f32 1.442695, %v645_v39  ;;  %v1808_v39 = vld [vmem:[#allocation15] sm:$0xff] }
 0x378   :  { %v702_v37 = vsel %vm641_vm8, %v698_v36, -inf }
 0x379   :  { %703 = vmax.xlane.f32.xlu1 %v702_v37  ;;  %1891 = vpow2.f32 %v646_v41  ;;  %v1809_v37 = vld [vmem:[#allocation15 + $0x8] sm:$0xff] }
 0x37f   :  { %v700_v40 = vpop.f32.mrf.mxu3  ;;  %v1892_v46 = vpop.eup %1891 }
 0x380   :  { %v648_v48 = vsel %vm641_vm8, %v1892_v46, 0.0 }
 0x387   :  { %v823_v43 = vpop.f32.mrf.mxu3 }
 0x388   :  { %v827_v44 = vsel %vm641_vm8, %v823_v43, -inf }
 0x389   :  { %828 = vmax.xlane.f32.xlu2 %v827_v44  ;;  %v1880_v44 = vld [vmem:[%s2503_s9] ss:$0 sm:$0xff] }
 0x38f   :  { %v825_v47 = vpop.f32.mrf.mxu3 }
 0x391   :  { %649 = vadd.xlane.f32.xlu2 %v648_v48 }
 0x3a9   :  { %715 = vrot.lane.b32.xlu2 %v2406_v8, %s2235_s7 }
 0x3e0   :  { %v767_v49 = vpop.xlane.xlu0 %766 }
 0x3e1   :  { %v768_v50 = vsub.f32 %v761_v33, %v767_v49 }
 0x3e3   :  { %v769_v51 = vmul.f32 1.442695, %v768_v50 }
 0x3e5   :  { %1893 = vpow2.f32 %v769_v51  ;;  %v1670_v51 = vld [vmem:[#allocation17 + $0x70] sm:$0xf] }
 0x3eb   :  { %v1894_v52 = vpop.eup %1893 }
 0x3ec   :  { %v704_v53 = vpop.xlane.xlu1 %703  ;;  %v771_v54 = vsel %vm641_vm8, %v1894_v52, 0.0 }
 0x3ed   :  { %v705_v55 = vsub.f32 %v698_v36, %v704_v53  ;;  %772 = vadd.xlane.f32.xlu1 %v771_v54  ;;  %v1810_v36 = vld [vmem:[#allocation15 + $0x10] sm:$0xff] }
 0x3ee   :  { %941 = vmatpush.bf16.msra.mxu1 %v1810_v36  ;;  %v1830_v53 = vld [vmem:[#allocation17 + $0x74] sm:$0xf]  ;;  %v1616_v36 = vld [vmem:[#allocation17 + $0x8] sm:$0xf0] }
 0x3ef   :  { %v706_v56 = vmul.f32 1.442695, %v705_v55  ;;  %v1672_v55 = vld [vmem:[#allocation17 + $0x78] sm:$0xf0] }
 0x3f1   :  { %1895 = vpow2.f32 %v706_v56  ;;  %v1675_v56 = vor.u32 %v1830_v53, %v1672_v55  ;;  %v1881_v53 = vld [vmem:[%s2504_s10] ss:$0 sm:$0xff] }
 0x3f2   :  { %942 = vmatpush.bf16.msra.mxu1 %v1809_v37 }
 0x3f3   :  { %1098 = vmatpush.bf16.msra.mxu3 %v1675_v56  ;;  %v1882_v56 = vld [vmem:[%s2505_s11] ss:$0 sm:$0xff] }
 0x3f6   :  { %943 = vmatpush.bf16.msra.mxu1 %v1808_v39  ;;  %v1839_v39 = vld [vmem:[#allocation18 + $0x38] sm:$0xff] }
 0x3f7   :  { %v1896_v57 = vpop.eup %1895 }
 0x3f8   :  { %v708_v58 = vsel %vm641_vm8, %v1896_v57, 0.0 }
 0x3f9   :  { %709 = vadd.xlane.f32.xlu1 %v708_v58 }
 0x3fc   :  { %v829_v59 = vpop.xlane.xlu2 %828 }
 0x3fd   :  { %v830_v60 = vsub.f32 %v823_v43, %v829_v59 }
 0x3ff   :  { %v831_v61 = vmul.f32 1.442695, %v830_v60 }
 0x401   :  { %1897 = vpow2.f32 %v831_v61  ;;  %v1662_v61 = vld [vmem:[#allocation17 + $0x60] sm:$0xf] }
 0x404   :  { %v650_v62 = vpop.xlane.xlu2 %649 }
 0x405   :  { %1899 = vrcp.f32 %v650_v62  ;;  %v1829_v62 = vld [vmem:[#allocation17 + $0x64] sm:$0xf0] }
 0x407   :  { %v1898_v63 = vpop.eup %1897 }
 0x408   :  { %v833_v0 = vsel %vm641_vm8, %v1898_v63, 0.0 }
 0x409   :  { %834 = vadd.xlane.f32.xlu0 %v833_v0  ;;  %v1663_v0 = vor.u32 %v1829_v62, %v1662_v61  ;;  %v1846_v61 = vld [vmem:[#allocation18 + $0x70] sm:$0xff]  ;;  %v1837_v62 = vld [vmem:[#allocation18 + $0x28] sm:$0xff] }
 0x40b   :  { %v1900_v1 = vpop.eup %1899 }
 0x40c   :  { %v652_v2 = vmul.f32 %v1900_v1, %v1892_v46  ;;  %v716_v3 = vpop.permute.xlu2 %715  ;;  %v1664_v1 = vld [vmem:[#allocation17 + $0x68] sm:$0xf0] }
 0x40d   :  { %v721_v4 = vsel %vm658_vm6, %v716_v3, 0  ;;  %v1654_v3 = vld [vmem:[#allocation17 + $0x50] sm:$0xf] }
 0x40e   :  { %730 = vmatpush.bf16.msra.mxu0 %v721_v4  ;;  %v653_v5 = vpack.c.bf16 %v652_v2, %v652_v2  ;;  %v1827_v4 = vld [vmem:[#allocation17 + $0x54] sm:$0xf0] }
 0x410   :  { %1573 = vmatmul.msk.bf16.vlgmr.msrb.gmra.mxu2 %vm654_vm9, %v653_v5  ;;  %v1826_v5 = vld [vmem:[#allocation17 + $0x54] sm:$0xf] }
 0x412   :  { %777 = vrot.lane.b32.xlu1 %v2406_v8, %s2221_s5 }
 0x41d   :  { %839 = vrot.lane.b32.xlu0 %v2406_v8, %s2236_s4 }
 0x460   :  { %v773_v6 = vpop.xlane.xlu1 %772 }
 0x46c   :  { %v710_v7 = vpop.xlane.xlu1 %709 }
 0x46d   :  { %1901 = vrcp.f32 %v710_v7  ;;  %v1656_v7 = vld [vmem:[#allocation17 + $0x58] sm:$0xf0] }
 0x46e   :  { %1903 = vrcp.f32 %v773_v6  ;;  %v1655_v6 = vor.u32 %v1827_v4, %v1654_v3  ;;  %v1834_v3 = vld [vmem:[#allocation18 + $0x10] sm:$0xff] }
 0x46f   :  { %v1842_v4 = vld [vmem:[#allocation18 + $0x50] sm:$0xff] }
 0x473   :  { %v1902_v45 = vpop.eup %1901 }
 0x474   :  { %v712_v9 = vmul.f32 %v1902_v45, %v1896_v57  ;;  %v1904_v11 = vpop.eup %1903  ;;  %v1659_v45 = vor.u32 %v1826_v5, %v1656_v7  ;;  %v1833_v5 = vld [vmem:[#allocation18 + $0x8] sm:$0xff]  ;;  %v1832_v7 = vld [vmem:[#allocation18] sm:$0xff] }
 0x475   :  { %v775_v13 = vmul.f32 %v1904_v11, %v1894_v52  ;;  %v1831_v52 = vld [vmem:[#allocation17 + $0x74] sm:$0xf0]  ;;  %v1824_v11 = vld [vmem:[#allocation17 + $0x44] sm:$0xf] }
 0x476   :  { %v713_v10 = vpack.c.bf16 %v712_v9, %v712_v9  ;;  %v1671_v54 = vor.u32 %v1831_v52, %v1670_v51  ;;  %v1646_v9 = vld [vmem:[#allocation17 + $0x40] sm:$0xf] }
 0x477   :  { %v776_v16 = vpack.c.bf16 %v775_v13, %v775_v13  ;;  %v1648_v13 = vld [vmem:[#allocation17 + $0x48] sm:$0xf0] }
 0x478   :  { %1575 = vmatmul.msk.bf16.vlgmr.msra.gmra.mxu0 %vm654_vm9, %v713_v10  ;;  %v1825_v10 = vld [vmem:[#allocation17 + $0x44] sm:$0xf0] }
 0x47c   :  { %v835_v12 = vpop.xlane.xlu0 %834 }
 0x47d   :  { %1905 = vrcp.f32 %v835_v12  ;;  %v1647_v12 = vor.u32 %v1825_v10, %v1646_v9  ;;  %v999_v9 = vld [vmem:[%s2507_s13] sm:$0x3] }
 0x47e   :  { %v1001_v10 = vperm.slane %v999_v9, 0 }
 0x483   :  { %v1906_v8 = vpop.eup %1905 }
 0x484   :  { %v778_v14 = vpop.permute.xlu1 %777  ;;  %v837_v17 = vmul.f32 %v1906_v8, %v1898_v63  ;;  %v1828_v63 = vld [vmem:[#allocation17 + $0x64] sm:$0xf]  ;;  %v1822_v8 = vld [vmem:[#allocation17 + $0x34] sm:$0xf] }
 0x485   :  { %v783_v15 = vsel %vm658_vm6, %v778_v14, 0  ;;  %v1667_v2 = vor.u32 %v1828_v63, %v1664_v1  ;;  %v1651_v14 = vor.u32 %v1824_v11, %v1648_v13  ;;  %v1845_v63 = vld [vmem:[#allocation18 + $0x68] sm:$0xff]  ;;  %v1844_v1 = vld [vmem:[#allocation18 + $0x60] sm:$0xff]  ;;  %v1002_v11 = vperm.slane %v999_v9, 1 }
 0x486   :  { %792 = vmatpush.bf16.msra.mxu2 %v783_v15  ;;  %v838_v20 = vpack.c.bf16 %v837_v17, %v837_v17  ;;  %v1638_v15 = vld [vmem:[#allocation17 + $0x30] sm:$0xf] }
 0x487   :  { %1099 = vmatpush.bf16.msra.mxu3 %v1667_v2  ;;  %v1843_v2 = vld [vmem:[#allocation18 + $0x58] sm:$0xff] }
 0x489   :  { %1577 = vmatmul.msk.bf16.vlgmr.msra.gmra.mxu2 %vm654_vm9, %v776_v16  ;;  %v1823_v16 = vld [vmem:[#allocation17 + $0x34] sm:$0xf0] }
 0x48a   :  { %1085 = vmatpush.bf16.msrb.mxu2 %v1671_v54  ;;  %v1639_v17 = vor.u32 %v1823_v16, %v1638_v15 }
 0x48b   :  { %1100 = vmatpush.bf16.msra.mxu3 %v1659_v45  ;;  %v1840_v45 = vld [vmem:[#allocation18 + $0x40] sm:$0xff] }
 0x48e   :  { %1086 = vmatpush.bf16.msrb.mxu2 %v1663_v0  ;;  %v1836_v0 = vld [vmem:[#allocation18 + $0x20] sm:$0xff] }
 0x48f   :  { %v840_v18 = vpop.permute.xlu0 %839  ;;  %1101 = vmatpush.bf16.msra.mxu3 %v1651_v14 }
 0x490   :  { %v845_v19 = vsel %vm658_vm6, %v840_v18, 0  ;;  %v1640_v18 = vld [vmem:[#allocation17 + $0x38] sm:$0xf0] }
 0x491   :  { %854 = vmatpush.bf16.msrb.mxu0 %v845_v19  ;;  %v1643_v19 = vor.u32 %v1822_v8, %v1640_v18 }
 0x492   :  { %1087 = vmatpush.bf16.msrb.mxu2 %v1655_v6  ;;  %v1841_v6 = vld [vmem:[#allocation18 + $0x48] sm:$0xff] }
 0x493   :  { %v671_v21 = vpop.f32.mrf.mxu2  ;;  %1102 = vmatpush.bf16.msra.mxu3 %v1643_v19 }
 0x494   :  { %676 = vst.msk [vmem:[#allocation2] sm:$0xf] %vm675_vm10, %v671_v21  ;;  %1579 = vmatmul.msk.bf16.vlgmr.msrb.gmra.mxu0 %vm654_vm9, %v838_v20  ;;  %v1630_v20 = vld [vmem:[#allocation17 + $0x20] sm:$0xf]  ;;  %v1821_v21 = vld [vmem:[#allocation17 + $0x24] sm:$0xf0] }
 0x495   :  { %1263 = vmatpush.bf16.msra.mxu0 %v1839_v39 }
 0x496   :  { %1088 = vmatpush.bf16.msrb.mxu2 %v1647_v12 }
 0x49a   :  { %1089 = vmatpush.bf16.msrb.mxu2 %v1639_v17 }
 0x49b   :  { %v673_v22 = vpop.f32.mrf.mxu2 }
 0x49c   :  { %v1820_v22 = vld [vmem:[#allocation17 + $0x24] sm:$0xf] }
 0x4f5   :  { %v732_v23 = vpop.f32.mrf.mxu0 }
 0x4f6   :  { %737 = vrot.lane.b32.xlu2 %v732_v23, %s2236_s4  ;;  %v1631_v23 = vor.u32 %v1821_v21, %v1630_v20 }
 0x4f8   :  { %1090 = vmatpush.bf16.msrb.mxu2 %v1631_v23 }
 0x4fd   :  { %v734_v25 = vpop.f32.mrf.mxu0 }
 0x4fe   :  { %v1632_v25 = vld [vmem:[#allocation17 + $0x28] sm:$0xf0] }
 0x50c   :  { %v794_v26 = vpop.f32.mrf.mxu2 }
 0x50d   :  { %799 = vrot.lane.b32.xlu2 %v794_v26, %s2221_s5  ;;  %v1635_v26 = vor.u32 %v1820_v22, %v1632_v25 }
 0x50f   :  { %1103 = vmatpush.bf16.msra.mxu3 %v1635_v26 }
 0x511   :  { %v856_v27 = vpop.f32.mrf.mxu0 }
 0x512   :  { %861 = vrot.lane.b32.xlu0 %v856_v27, %s2235_s7  ;;  %v1622_v27 = vld [vmem:[#allocation17 + $0x10] sm:$0xf] }
 0x514   :  { %v796_v28 = vpop.f32.mrf.mxu2 }
 0x515   :  { %v1819_v28 = vld [vmem:[#allocation17 + $0x14] sm:$0xf0] }
 0x516   :  { %v1623_v30 = vor.u32 %v1819_v28, %v1622_v27 }
 0x518   :  { %1091 = vmatpush.bf16.msrb.mxu2 %v1623_v30 }
 0x519   :  { %v858_v29 = vpop.f32.mrf.mxu0 }
 0x51a   :  { %v1818_v29 = vld [vmem:[#allocation17 + $0x14] sm:$0xf] }
 0x51b   :  { %v1627_v34 = vor.u32 %v1818_v29, %v1624_v31 }
 0x51d   :  { %1104 = vmatpush.bf16.msra.mxu3 %v1627_v34 }
 0x550   :  { %v738_v33 = vpop.permute.xlu2 %737 }
 0x551   :  { %741 = vst.msk [vmem:[#allocation2] sm:$0xf] %vm740_vm11, %v738_v33  ;;  %v1817_v33 = vld [vmem:[#allocation17 + $0x4] sm:$0xf0] }
 0x552   :  { %v1615_v37 = vor.u32 %v1817_v33, %v1614_v32 }
 0x554   :  { %1092 = vmatpush.bf16.msrb.mxu2 %v1615_v37 }
 0x567   :  { %v800_v38 = vpop.permute.xlu2 %799 }
 0x568   :  { %803 = vst.msk [vmem:[#allocation2] sm:$0xf] %vm802_vm12, %v800_v38  ;;  %v1619_v38 = vor.u32 %v1816_v35, %v1616_v36 }
 0x56a   :  { %1105 = vmatpush.bf16.msra.mxu3 %v1619_v38  ;;  %v1883_v38 = vld [vmem:[%s2509_s15] ss:$0 sm:$0xff] }
 0x584   :  { %v862_v40 = vpop.permute.xlu0 %861 }
 0x585   :  { %865 = vst.msk [vmem:[#allocation2] sm:$0xf] %vm864_vm13, %v862_v40  ;;  %v1847_v40 = vld [vmem:[#allocation18 + $0x78] sm:$0xff] }
 0x586   :  { %1276 = vmatpush.bf16.msrb.mxu1 %v1847_v40 }
 0x58a   :  { %1277 = vmatpush.bf16.msrb.mxu1 %v1846_v61  ;;  %v1848_v61 = vld [vmem:[#allocation20] sm:$0xff] }
 0x58c   :  { %v866_v41 = vld [vmem:[#allocation2] sm:$0xf] }
 0x58d   :  { %v867_v43 = vpack.c.bf16 %v866_v41, %v866_v41 }
 0x58e   :  { %1278 = vmatpush.bf16.msrb.mxu1 %v1845_v63 }
 0x58f   :  { %944 = vmatmul.bf16.vlgmr.msra.gmra.mxu1 %v867_v43 }
 0x592   :  { %1279 = vmatpush.bf16.msrb.mxu1 %v1844_v1 }
 0x596   :  { %1280 = vmatpush.bf16.msrb.mxu1 %v1843_v2 }
 0x59a   :  { %1281 = vmatpush.bf16.msrb.mxu1 %v1842_v4 }
 0x59e   :  { %1282 = vmatpush.bf16.msrb.mxu1 %v1841_v6  ;;  %v1884_v6 = vld [vmem:[%s2510_s16] ss:$0 sm:$0xff]  ;;  %s1412_s16 = sshll.u32 %s2526_s27, 4  ;;  %s1413_s16 = int_to_ptr.hbm [resolvable:$true] %s1412_s16 }
 0x5a2   :  { %1283 = vmatpush.bf16.msrb.mxu1 %v1840_v45 }
 0x60c   :  { %v945_v46 = vpop.f32.mrf.mxu1 }
 0x60d   :  { %v946_v47 = vadd.f32 %v1880_v44, %v945_v46 }
 0x60f   :  { %v2452_v48 = vadd.f32 %v946_v47, %v2388_v24 }
 0x611   :  { %v952_v49 = vsel %vm371_vm1, %v2452_v48, 0.0 }
 0x612   :  { %953 = vadd.xlane.f32.xlu1 %v952_v49 }
 0x614   :  { %v947_v50 = vpop.f32.mrf.mxu1 }
 0x685   :  { %v954_v57 = vpop.xlane.xlu1 %953 }
 0x686   :  { %v955_v58 = vmul.f32 %v954_v57, %v2392_v42 }
 0x688   :  { %v2458_v59 = vsub.f32 %v2452_v48, %v955_v58 }
 0x68a   :  { %v957_v24 = vmul.f32 %v2458_v59, %v2458_v59 }
 0x68c   :  { %v958_v60 = vsel %vm371_vm1, %v957_v24, 0.0 }
 0x68d   :  { %959 = vadd.xlane.f32.xlu2 %v958_v60  ;;  %v1838_v60 = vld [vmem:[#allocation18 + $0x30] sm:$0xff] }
 0x68e   :  { %1264 = vmatpush.bf16.msra.mxu0 %v1838_v60  ;;  %v1849_v60 = vld [vmem:[#allocation20 + $0x8] sm:$0xff] }
 0x692   :  { %1265 = vmatpush.bf16.msra.mxu0 %v1837_v62 }
 0x696   :  { %1266 = vmatpush.bf16.msra.mxu0 %v1836_v0 }
 0x700   :  { %v960_v41 = vpop.xlane.xlu2 %959 }
 0x701   :  { %v961_v43 = vmul.f32 %v960_v41, %v2392_v42 }
 0x703   :  { %v962_v44 = vadd.f32 1e-05, %v961_v43 }
 0x705   :  { %1907 = vrsqrt.f32 %v962_v44  ;;  %vm969_vm15 = vweird.f32 %v962_v44 }
 0x70b   :  { %v1908_v46 = vpop.eup %1907 }
 0x70c   :  { %v964_v47 = vmul.f32 %v1908_v46, %v962_v44  ;;  %vm970_vm14 = vweird.f32 %v1908_v46 }
 0x70d   :  { %vm971_vm0 = vmor %vm969_vm15, %vm970_vm14 }
 0x70e   :  { %v965_v49 = vmul.f32 %v1908_v46, %v964_v47 }
 0x710   :  { %v966_v50 = vmul.f32 0.5, %v965_v49 }
 0x712   :  { %v967_v51 = vsub.f32 1.5, %v966_v50  ;;  %v1855_v50 = vld [vmem:[#allocation20 + $0x38] sm:$0xff] }
 0x713   :  { %1391 = vmatpush.bf16.msra.mxu2 %v1855_v50 }
 0x714   :  { %v968_v52 = vmul.f32 %v1908_v46, %v967_v51 }
 0x716   :  { %v972_v54 = vsel %vm971_vm0, %v1908_v46, %v968_v52 }
 0x717   :  { %v973_v55 = vmul.f32 %v972_v54, %v2458_v59  ;;  %v1835_v59 = vld [vmem:[#allocation18 + $0x18] sm:$0xff] }
 0x718   :  { %1267 = vmatpush.bf16.msra.mxu0 %v1835_v59 }
 0x719   :  { %v977_v57 = vmul.f32 %v1881_v53, %v973_v55 }
 0x71b   :  { %v981_v58 = vadd.f32 %v1882_v56, %v977_v57  ;;  %v1854_v56 = vld [vmem:[#allocation20 + $0x30] sm:$0xff]  ;;  %v1853_v57 = vld [vmem:[#allocation20 + $0x28] sm:$0xff] }
 0x71c   :  { %1268 = vmatpush.bf16.msra.mxu0 %v1834_v3  ;;  %1392 = vmatpush.bf16.msra.mxu2 %v1854_v56 }
 0x71d   :  { %v982_v24 = vpack.c.bf16 %v981_v58, %v981_v58  ;;  %v1851_v58 = vld [vmem:[#allocation20 + $0x18] sm:$0xff] }
 0x71f   :  { %1093 = vmatmul.bf16.vlgmr.msrb.gmra.mxu2 %v982_v24  ;;  %1106 = vmatmul.bf16.vlgmr.msra.gmra.mxu3 %v982_v24  ;;  %v1850_v24 = vld [vmem:[#allocation20 + $0x10] sm:$0xff] }
 0x720   :  { %1269 = vmatpush.bf16.msra.mxu0 %v1833_v5  ;;  %1393 = vmatpush.bf16.msra.mxu2 %v1853_v57 }
 0x724   :  { %1270 = vmatpush.bf16.msra.mxu0 %v1832_v7 }
 0x7a2   :  { %v1094_v12 = vpop.f32.mrf.mxu2  ;;  %v1107_v13 = vpop.f32.mrf.mxu3 }
 0x7a3   :  { %v1095_v14 = vadd.f32 %v1094_v12, %v1001_v10  ;;  %v1108_v15 = vadd.f32 %v1107_v13, %v1002_v11  ;;  %v1886_v12 = vld [vmem:[%s2513_s19] ss:$0 sm:$0xff] }
 0x7a5   :  { %v1111_v16 = vmul.f32 %v1095_v14, %v1095_v14  ;;  %v1112_v8 = vmul.f32 %v1108_v15, %v1108_v15 }
 0x7a7   :  { %v1113_v17 = vmul.f32 %v1111_v16, %v1095_v14  ;;  %v1114_v18 = vmul.f32 %v1112_v8, %v1108_v15 }
 0x7a9   :  { %v1115_v19 = vmul.f32 0.044715, %v1113_v17  ;;  %v1116_v20 = vmul.f32 0.044715, %v1114_v18 }
 0x7aa   :  { %v1096_v21 = vpop.f32.mrf.mxu2  ;;  %v1109_v22 = vpop.f32.mrf.mxu3 }
 0x7ab   :  { %v1117_v23 = vadd.f32 %v1115_v19, %v1095_v14  ;;  %v1118_v25 = vadd.f32 %v1116_v20, %v1108_v15 }
 0x7ad   :  { %v1119_v26 = vmul.f32 0.7978846, %v1117_v23  ;;  %v1120_v27 = vmul.f32 0.7978846, %v1118_v25 }
 0x7af   :  { %1909 = vtanh.f32 %v1119_v26 }
 0x7b0   :  { %1911 = vtanh.f32 %v1120_v27 }
 0x7b5   :  { %v1910_v28 = vpop.eup %1909 }
 0x7b6   :  { %v1912_v29 = vpop.eup %1911  ;;  %v1123_v30 = vadd.f32 1.0, %v1910_v28 }
 0x7b7   :  { %v1124_v31 = vadd.f32 1.0, %v1912_v29 }
 0x7b8   :  { %v1125_v32 = vmul.f32 0.5, %v1123_v30 }
 0x7b9   :  { %v1126_v33 = vmul.f32 0.5, %v1124_v31 }
 0x7ba   :  { %v1127_v34 = vmul.f32 %v1125_v32, %v1095_v14 }
 0x7bb   :  { %v1128_v35 = vmul.f32 %v1126_v33, %v1108_v15 }
 0x7bc   :  { %v1129_v36 = vpack.c.bf16 %v1127_v34, %v1127_v34 }
 0x7bd   :  { %v1130_v37 = vpack.c.bf16 %v1128_v35, %v1128_v35 }
 0x7be   :  { %1271 = vmatmul.bf16.vlgmr.msra.gmra.mxu0 %v1129_v36 }
 0x7bf   :  { %1284 = vmatmul.bf16.vlgmr.msrb.gmra.mxu1 %v1130_v37 }
 0x83b   :  { %v1272_v39 = vpop.f32.mrf.mxu0 }
 0x83c   :  { %v1273_v40 = vadd.f32 %v1883_v38, %v1272_v39  ;;  %v1285_v41 = vpop.f32.mrf.mxu1 }
 0x83e   :  { %v1286_v43 = vadd.f32 %v1285_v41, %v1273_v40 }
 0x840   :  { %v1289_v44 = vadd.f32 %v1286_v43, %v2452_v48  ;;  %v1852_v48 = vld [vmem:[#allocation20 + $0x20] sm:$0xff] }
 0x841   :  { %1394 = vmatpush.bf16.msra.mxu2 %v1852_v48 }
 0x842   :  { %v1292_v46 = vsel %vm371_vm1, %v1289_v44, 0.0 }
 0x843   :  { %v1274_v47 = vpop.f32.mrf.mxu0  ;;  %1293 = vadd.xlane.f32.xlu0 %v1292_v46 }
 0x844   :  { %v1287_v49 = vpop.f32.mrf.mxu1 }
 0x845   :  { %1395 = vmatpush.bf16.msra.mxu2 %v1851_v58 }
 0x849   :  { %1396 = vmatpush.bf16.msra.mxu2 %v1850_v24 }
 0x84d   :  { %1397 = vmatpush.bf16.msra.mxu2 %v1849_v60 }
 0x851   :  { %1398 = vmatpush.bf16.msra.mxu2 %v1848_v61 }
 0x8b6   :  { %v1294_v51 = vpop.xlane.xlu0 %1293 }
 0x8b7   :  { %v1295_v52 = vmul.f32 %v1294_v51, %v2392_v42 }
 0x8b9   :  { %v1296_v53 = vsub.f32 %v1289_v44, %v1295_v52 }
 0x8bb   :  { %v1297_v54 = vmul.f32 %v1296_v53, %v1296_v53 }
 0x8bd   :  { %v1298_v55 = vsel %vm371_vm1, %v1297_v54, 0.0 }
 0x8be   :  { %1299 = vadd.xlane.f32.xlu1 %v1298_v55 }
 0x931   :  { %v1300_v62 = vpop.xlane.xlu1 %1299 }
 0x932   :  { %v1301_v63 = vmul.f32 %v1300_v62, %v2392_v42  ;;  %v1885_v42 = vld [vmem:[%s2511_s17] ss:$0 sm:$0xff] }
 0x934   :  { %v1302_v0 = vadd.f32 1e-05, %v1301_v63 }
 0x936   :  { %1913 = vrsqrt.f32 %v1302_v0  ;;  %vm1309_vm2 = vweird.f32 %v1302_v0 }
 0x93c   :  { %v1914_v1 = vpop.eup %1913 }
 0x93d   :  { %v1304_v59 = vmul.f32 %v1914_v1, %v1302_v0  ;;  %vm1310_vm1 = vweird.f32 %v1914_v1 }
 0x93e   :  { %vm1311_vm3 = vmor %vm1309_vm2, %vm1310_vm1 }
 0x93f   :  { %v1305_v2 = vmul.f32 %v1914_v1, %v1304_v59 }
 0x941   :  { %v1306_v3 = vmul.f32 0.5, %v1305_v2 }
 0x943   :  { %v1307_v4 = vsub.f32 1.5, %v1306_v3 }
 0x945   :  { %v1308_v5 = vmul.f32 %v1914_v1, %v1307_v4 }
 0x947   :  { %v1312_v7 = vsel %vm1311_vm3, %v1914_v1, %v1308_v5 }
 0x948   :  { %v1313_v45 = vmul.f32 %v1312_v7, %v1296_v53 }
 0x94a   :  { %v1317_v9 = vmul.f32 %v1884_v6, %v1313_v45 }
 0x94c   :  { %v1321_v10 = vadd.f32 %v1885_v42, %v1317_v9 }
 0x94e   :  { %v1322_v11 = vpack.c.bf16 %v1321_v10, %v1321_v10 }
 0x950   :  { %1399 = vmatmul.bf16.vlgmr.msra.gmra.mxu2 %v1322_v11 }
 0x9d3   :  { %v1400_v13 = vpop.f32.mrf.mxu2 }
 0x9d4   :  { %v1401_v14 = vadd.f32 %v1886_v12, %v1400_v13 }
 0x9d6   :  { %1404 = vst [vmem:[#allocation21] sm:$0xf] %v1401_v14 }
 0x9d7   :  { %1415 = dma.vmem_to_hbm [thread:$0]  %s1411_s28, 64, %s1413_s16, [#allocation5]  }
 0x9db   :  { %v1402_v15 = vpop.f32.mrf.mxu2 }
 0x9dc   :  { %2215 = dma.done.wait [#allocation5], 64  }
 0x9dd   :  { %2216 = vsyncadd [#allocation5], 4294967232 }
 0x9de   :  { %1420 = vsyncpa [#allocation4], 1 }
 0x9df   :  { %1421 = vsyncpa [#allocation7], 1 }
 0x9e0   :  { %1422 = vsyncpa [#allocation10], 1 }
 0x9e1   :  { %1423 = vsyncpa [#allocation13], 1 }
 0x9e2   :  { %1424 = vsyncpa [#allocation16], 1 }
 0x9e3   :  { %1425 = vsyncpa [#allocation19], 1 }
 0x9e4   :  { %1426 = vsyncpa [#allocation5], 1 }

</bundles_post_ra>
